<compile_context>
chip_gen: v7x
topology: tpu7x:2x2x1
jax: 0.10.0
libtpu: 0.0.40
codegen_flags: <defaults>
</compile_context>

<pallas_src>
import functools

import jax
import jax.numpy as jnp
from jax.experimental import pallas as pl
from jax.experimental.pallas import tpu as pltpu

_LANE = 128
_SUBLANE = 8


def _gru_kernel(layer_dim, hidden_dim, hp, seq_len, bp, *refs):
    """refs = [x_flat, (wih_cat, whh_cat, bih_cat, bhh_cat) * L, fc_w, fc_b,
               out, gi0_scratch]."""
    L, H, Hp, T, Bp = layer_dim, hidden_dim, hp, seq_len, bp
    f32 = jnp.float32

    x_ref = refs[0]                                   # (T*Bp, D)
    layers = [refs[1 + 4 * l: 1 + 4 * l + 4] for l in range(L)]
    fcw_ref = refs[1 + 4 * L]                         # (H, O)
    fcb_ref = refs[2 + 4 * L]                         # (1, O)
    out_ref = refs[3 + 4 * L]                         # (Bp, O)
    gi0_ref = refs[4 + 4 * L]                         # (T*Bp, 3*Hp) scratch

    # ---- hoisted layer-0 input projection: one fused matmul for all gates
    # and all timesteps (pure MXU throughput work, off the serial chain).
    wih0_ref, _, bih0_ref, _ = layers[0]
    gi0_ref[...] = (
        jnp.dot(x_ref[...], wih0_ref[...], preferred_element_type=f32)
        + bih0_ref[...]
    )

    # ---- per-layer constants loaded / broadcast ONCE (JAX does not CSE
    # broadcast_in_dim, so hoist explicitly out of the time loop).
    whh = [layers[l][1][...] for l in range(L)]                       # (H, 3*Hp)
    bhh = [jnp.broadcast_to(layers[l][3][...], (Bp, 3 * Hp)) for l in range(L)]
    wih = [layers[l][0][...] for l in range(1, L)]                    # (H, 3*Hp)
    bih = [jnp.broadcast_to(layers[l][2][...], (Bp, 3 * Hp)) for l in range(1, L)]

    def gru_step(gi, gh, h):
        # gi, gh: (Bp, 3*Hp) with gate g in lanes [g*Hp, g*Hp + H) -> slices
        # below are lane-tile aligned (Hp is a multiple of 128).
        r = jax.nn.sigmoid(gi[:, 0:H] + gh[:, 0:H])
        z = jax.nn.sigmoid(gi[:, Hp:Hp + H] + gh[:, Hp:Hp + H])
        n = jnp.tanh(gi[:, 2 * Hp:2 * Hp + H] + r * gh[:, 2 * Hp:2 * Hp + H])
        return n + z * (h - n)            # == (1 - z) * n + z * h

    h = [jnp.zeros((Bp, H), f32) for _ in range(L)]   # h0 = zeros, like the module

    # ---- wavefront recurrence, fully unrolled (T static & small).
    for t in range(T):
        lo = t * Bp                                   # multiple of 8: tile-aligned
        gi = gi0_ref[lo:lo + Bp, :]                   # (Bp, 3*Hp)
        gh = jnp.dot(h[0], whh[0], preferred_element_type=f32) + bhh[0]
        h[0] = gru_step(gi, gh, h[0])
        for l in range(1, L):
            # per-step input projection from the layer below (single fused
            # matmul; independent of layer l's own recurrent chain).
            gi_l = jnp.dot(h[l - 1], wih[l - 1], preferred_element_type=f32) + bih[l - 1]
            gh_l = jnp.dot(h[l], whh[l], preferred_element_type=f32) + bhh[l]
            h[l] = gru_step(gi_l, gh_l, h[l])

    # out = h_T @ fc_w.T + fc_b   (fc weight passed pre-transposed)
    out_ref[...] = (
        jnp.dot(h[L - 1], fcw_ref[...], preferred_element_type=f32) + fcb_ref[...]
    )


def _pad_gate_major(w3, hp):
    """(3, rows, H) -> (rows, 3*Hp), gate g in columns [g*Hp, g*Hp+H)."""
    three, rows, h = w3.shape
    w3p = jnp.pad(w3, ((0, 0), (0, 0), (0, hp - h)))
    return jnp.transpose(w3p, (1, 0, 2)).reshape(rows, three * hp)


def gru_model_forward(x, gru_params, fc_w, fc_b, *, hidden_dim, output_dim):
    """x: (B, T, D) batch_first, like the PyTorch module.  Inference semantics."""
    B, T, D = x.shape
    H = hidden_dim
    L = len(gru_params)
    Hp = ((H + _LANE - 1) // _LANE) * _LANE           # per-gate lane padding
    Bp = max(((B + _SUBLANE - 1) // _SUBLANE) * _SUBLANE, _SUBLANE)

    # time-major, batch padded to one sublane tile, flattened -> (T*Bp, D).
    # Every per-timestep block then starts at a sublane-aligned offset.
    xt = jnp.transpose(x, (1, 0, 2)).astype(jnp.float32)          # (T, B, D)
    xt = jnp.pad(xt, ((0, 0), (0, Bp - B), (0, 0)))
    x_flat = xt.reshape(T * Bp, D)

    kernel_inputs = [x_flat]
    for (w_ih, w_hh, b_ih, b_hh) in gru_params:
        in_d = w_ih.shape[1]
        # PyTorch gate order [r | z | n]; split per gate, transpose, pad to
        # lane boundary, and concatenate gate-major along the lane axis.
        wih3 = w_ih.reshape(3, H, in_d).transpose(0, 2, 1).astype(jnp.float32)  # (3, Din, H)
        whh3 = w_hh.reshape(3, H, H).transpose(0, 2, 1).astype(jnp.float32)     # (3, H, H)
        wih_cat = _pad_gate_major(wih3, Hp)                        # (Din, 3*Hp)
        whh_cat = _pad_gate_major(whh3, Hp)                        # (H,   3*Hp)
        bih_cat = _pad_gate_major(b_ih.reshape(3, 1, H).astype(jnp.float32), Hp)  # (1, 3*Hp)
        bhh_cat = _pad_gate_major(b_hh.reshape(3, 1, H).astype(jnp.float32), Hp)  # (1, 3*Hp)
        kernel_inputs += [wih_cat, whh_cat, bih_cat, bhh_cat]
    kernel_inputs.append(fc_w.T.astype(jnp.float32))               # (H, O)
    kernel_inputs.append(fc_b.reshape(1, -1).astype(jnp.float32))  # (1, O)

    vmem_spec = pl.BlockSpec(memory_space=pltpu.MemorySpace.VMEM)

    out = pl.pallas_call(
        functools.partial(_gru_kernel, L, H, Hp, T, Bp),
        out_shape=jax.ShapeDtypeStruct((Bp, output_dim), jnp.float32),
        in_specs=[vmem_spec] * len(kernel_inputs),
        out_specs=vmem_spec,
        scratch_shapes=[
            # hoisted layer-0 per-gate input projections (+ b_ih), all steps.
            pltpu.VMEM((T * Bp, 3 * Hp), jnp.float32),
        ],
        compiler_params=pltpu.CompilerParams(vmem_limit_bytes=32 * 1024 * 1024),
    )(*kernel_inputs)
    return out[:B]


def gru_model_reference(x, gru_params, fc_w, fc_b, *, hidden_dim):
    """Pure-JAX reference matching torch.nn.GRU (batch_first, no dropout at eval)."""
    B, T, _ = x.shape
    H = hidden_dim
    seq = x
    for (w_ih, w_hh, b_ih, b_hh) in gru_params:
        h = jnp.zeros((B, H), jnp.float32)
        outs = []
        for t in range(T):
            x_t = seq[:, t, :]
            gi = x_t @ w_ih.T + b_ih
            gh = h @ w_hh.T + b_hh
            r = jax.nn.sigmoid(gi[:, 0:H] + gh[:, 0:H])
            z = jax.nn.sigmoid(gi[:, H:2 * H] + gh[:, H:2 * H])
            n = jnp.tanh(gi[:, 2 * H:3 * H] + r * gh[:, 2 * H:3 * H])
            h = (1.0 - z) * n + z * h
            outs.append(h)
        seq = jnp.stack(outs, axis=1)
    return seq[:, -1, :] @ fc_w.T + fc_b


if __name__ == "__main__":
    # Small shapes consistent with the module's forward.
    batch, seq_len = 2, 8
    input_dim, hidden_dim, layer_dim, output_dim = 4, 32, 2, 3

    key = jax.random.PRNGKey(0)
    bound = 1.0 / (hidden_dim ** 0.5)   # PyTorch GRU/Linear default init range

    gru_params = []
    for l in range(layer_dim):
        in_d = input_dim if l == 0 else hidden_dim
        key, k1, k2, k3, k4 = jax.random.split(key, 5)
        w_ih = jax.random.uniform(k1, (3 * hidden_dim, in_d), jnp.float32, -bound, bound)
        w_hh = jax.random.uniform(k2, (3 * hidden_dim, hidden_dim), jnp.float32, -bound, bound)
        b_ih = jax.random.uniform(k3, (3 * hidden_dim,), jnp.float32, -bound, bound)
        b_hh = jax.random.uniform(k4, (3 * hidden_dim,), jnp.float32, -bound, bound)
        gru_params.append((w_ih, w_hh, b_ih, b_hh))

    key, kfw, kfb, kx = jax.random.split(key, 4)
    fc_w = jax.random.uniform(kfw, (output_dim, hidden_dim), jnp.float32, -bound, bound)
    fc_b = jax.random.uniform(kfb, (output_dim,), jnp.float32, -bound, bound)

    x = jax.random.normal(kx, (batch, seq_len, input_dim), jnp.float32)

    out = gru_model_forward(
        x, gru_params, fc_w, fc_b, hidden_dim=hidden_dim, output_dim=output_dim
    )
    out = jax.block_until_ready(out)

    ref = gru_model_reference(x, gru_params, fc_w, fc_b, hidden_dim=hidden_dim)
    assert out.shape == (batch, output_dim)
    assert jnp.allclose(out, ref, atol=1e-4, rtol=1e-4), "Pallas GRU mismatch vs reference"

    print("KERNEL_OK")
</pallas_src>

<mosaic_0001>
module attributes {stable_mosaic.version = 11 : i64} {
  func.func @_gru_kernel(%arg0: memref<64x4xf32, #tpu.memory_space<vmem>>, %arg1: memref<4x384xf32, #tpu.memory_space<vmem>>, %arg2: memref<32x384xf32, #tpu.memory_space<vmem>>, %arg3: memref<1x384xf32, #tpu.memory_space<vmem>>, %arg4: memref<1x384xf32, #tpu.memory_space<vmem>>, %arg5: memref<32x384xf32, #tpu.memory_space<vmem>>, %arg6: memref<32x384xf32, #tpu.memory_space<vmem>>, %arg7: memref<1x384xf32, #tpu.memory_space<vmem>>, %arg8: memref<1x384xf32, #tpu.memory_space<vmem>>, %arg9: memref<32x3xf32, #tpu.memory_space<vmem>>, %arg10: memref<1x3xf32, #tpu.memory_space<vmem>>, %arg11: memref<8x3xf32, #tpu.memory_space<vmem>>, %arg12: memref<64x384xf32, #tpu.memory_space<vmem>>) attributes {dimension_semantics = [], scalar_prefetch = 0 : i64, scratch_operands = 1 : i64, tpu.core_type = #tpu.core_type<tc>} {
    %c0 = arith.constant 0 : index
    %c0_0 = arith.constant 0 : index
    %0 = vector.load %arg0[%c0, %c0_0] : memref<64x4xf32, #tpu.memory_space<vmem>>, vector<64x4xf32>
    %c0_1 = arith.constant 0 : index
    %c0_2 = arith.constant 0 : index
    %1 = vector.load %arg1[%c0_1, %c0_2] : memref<4x384xf32, #tpu.memory_space<vmem>>, vector<4x384xf32>
    %cst = arith.constant dense<0.000000e+00> : vector<64x384xf32>
    %2 = tpu.matmul %0, %1, %cst {dimension_numbers = #tpu.dot_dimension_numbers<[1], [0], [0], [1], [0, 0, 1, 1], [], []>} : vector<64x4xf32>, vector<4x384xf32>, vector<64x384xf32> -> vector<64x384xf32>
    %c0_3 = arith.constant 0 : index
    %c0_4 = arith.constant 0 : index
    %3 = vector.load %arg3[%c0_3, %c0_4] : memref<1x384xf32, #tpu.memory_space<vmem>>, vector<1x384xf32>
    %4 = vector.broadcast %3 : vector<1x384xf32> to vector<64x384xf32>
    %5 = arith.addf %2, %4 : vector<64x384xf32>
    %c0_5 = arith.constant 0 : index
    %c0_6 = arith.constant 0 : index
    %6 = vector.load %arg12[%c0_5, %c0_6] : memref<64x384xf32, #tpu.memory_space<vmem>>, vector<64x384xf32>
    tpu.vector_store %arg12[%c0_5, %c0_6], %5 {strides = array<i32>} : memref<64x384xf32, #tpu.memory_space<vmem>>, vector<64x384xf32>,
    %c0_7 = arith.constant 0 : index
    %c0_8 = arith.constant 0 : index
    %7 = vector.load %arg2[%c0_7, %c0_8] : memref<32x384xf32, #tpu.memory_space<vmem>>, vector<32x384xf32>
    %c0_9 = arith.constant 0 : index
    %c0_10 = arith.constant 0 : index
    %8 = vector.load %arg6[%c0_9, %c0_10] : memref<32x384xf32, #tpu.memory_space<vmem>>, vector<32x384xf32>
    %c0_11 = arith.constant 0 : index
    %c0_12 = arith.constant 0 : index
    %9 = vector.load %arg4[%c0_11, %c0_12] : memref<1x384xf32, #tpu.memory_space<vmem>>, vector<1x384xf32>
    %10 = vector.shape_cast %9 : vector<1x384xf32> to vector<1x384xf32>
    %11 = vector.broadcast %10 : vector<1x384xf32> to vector<8x384xf32>
    %c0_13 = arith.constant 0 : index
    %c0_14 = arith.constant 0 : index
    %12 = vector.load %arg8[%c0_13, %c0_14] : memref<1x384xf32, #tpu.memory_space<vmem>>, vector<1x384xf32>
    %13 = vector.shape_cast %12 : vector<1x384xf32> to vector<1x384xf32>
    %14 = vector.broadcast %13 : vector<1x384xf32> to vector<8x384xf32>
    %c0_15 = arith.constant 0 : index
    %c0_16 = arith.constant 0 : index
    %15 = vector.load %arg5[%c0_15, %c0_16] : memref<32x384xf32, #tpu.memory_space<vmem>>, vector<32x384xf32>
    %c0_17 = arith.constant 0 : index
    %c0_18 = arith.constant 0 : index
    %16 = vector.load %arg7[%c0_17, %c0_18] : memref<1x384xf32, #tpu.memory_space<vmem>>, vector<1x384xf32>
    %17 = vector.shape_cast %16 : vector<1x384xf32> to vector<1x384xf32>
    %18 = vector.broadcast %17 : vector<1x384xf32> to vector<8x384xf32>
    %cst_19 = arith.constant 0.000000e+00 : f32
    %19 = vector.broadcast %cst_19 : f32 to vector<8x32xf32>
    %cst_20 = arith.constant 0.000000e+00 : f32
    %20 = vector.broadcast %cst_20 : f32 to vector<8x32xf32>
    %c0_21 = arith.constant 0 : index
    %c0_22 = arith.constant 0 : index
    %21 = vector.load %arg12[%c0_21, %c0_22] : memref<64x384xf32, #tpu.memory_space<vmem>>, vector<8x384xf32>
    %cst_23 = arith.constant dense<0.000000e+00> : vector<8x384xf32>
    %22 = tpu.matmul %19, %7, %cst_23 {dimension_numbers = #tpu.dot_dimension_numbers<[1], [0], [0], [1], [0, 0, 1, 1], [], []>} : vector<8x32xf32>, vector<32x384xf32>, vector<8x384xf32> -> vector<8x384xf32>
    %23 = arith.addf %22, %11 : vector<8x384xf32>
    %24 = vector.extract_strided_slice %21 {offsets = [0, 0], sizes = [8, 32], strides = [1, 1]} : vector<8x384xf32> to vector<8x32xf32>
    %25 = vector.extract_strided_slice %23 {offsets = [0, 0], sizes = [8, 32], strides = [1, 1]} : vector<8x384xf32> to vector<8x32xf32>
    %26 = arith.addf %24, %25 : vector<8x32xf32>
    %27 = arith.negf %26 : vector<8x32xf32>
    %28 = math.exp %27 : vector<8x32xf32>
    %cst_24 = arith.constant 1.000000e+00 : f32
    %29 = vector.broadcast %cst_24 : f32 to vector<8x32xf32>
    %30 = arith.addf %29, %28 : vector<8x32xf32>
    %31 = arith.divf %29, %30 : vector<8x32xf32>
    %32 = vector.extract_strided_slice %21 {offsets = [0, 128], sizes = [8, 32], strides = [1, 1]} : vector<8x384xf32> to vector<8x32xf32>
    %33 = vector.extract_strided_slice %23 {offsets = [0, 128], sizes = [8, 32], strides = [1, 1]} : vector<8x384xf32> to vector<8x32xf32>
    %34 = arith.addf %32, %33 : vector<8x32xf32>
    %35 = arith.negf %34 : vector<8x32xf32>
    %36 = math.exp %35 : vector<8x32xf32>
    %cst_25 = arith.constant 1.000000e+00 : f32
    %37 = vector.broadcast %cst_25 : f32 to vector<8x32xf32>
    %38 = arith.addf %37, %36 : vector<8x32xf32>
    %39 = arith.divf %37, %38 : vector<8x32xf32>
    %40 = vector.extract_strided_slice %21 {offsets = [0, 256], sizes = [8, 32], strides = [1, 1]} : vector<8x384xf32> to vector<8x32xf32>
    %41 = vector.extract_strided_slice %23 {offsets = [0, 256], sizes = [8, 32], strides = [1, 1]} : vector<8x384xf32> to vector<8x32xf32>
    %42 = arith.mulf %31, %41 : vector<8x32xf32>
    %43 = arith.addf %40, %42 : vector<8x32xf32>
    %44 = math.tanh %43 : vector<8x32xf32>
    %45 = arith.subf %19, %44 : vector<8x32xf32>
    %46 = arith.mulf %39, %45 : vector<8x32xf32>
    %47 = arith.addf %44, %46 : vector<8x32xf32>
    %cst_26 = arith.constant dense<0.000000e+00> : vector<8x384xf32>
    %48 = tpu.matmul %47, %15, %cst_26 {dimension_numbers = #tpu.dot_dimension_numbers<[1], [0], [0], [1], [0, 0, 1, 1], [], []>} : vector<8x32xf32>, vector<32x384xf32>, vector<8x384xf32> -> vector<8x384xf32>
    %49 = arith.addf %48, %18 : vector<8x384xf32>
    %cst_27 = arith.constant dense<0.000000e+00> : vector<8x384xf32>
    %50 = tpu.matmul %20, %8, %cst_27 {dimension_numbers = #tpu.dot_dimension_numbers<[1], [0], [0], [1], [0, 0, 1, 1], [], []>} : vector<8x32xf32>, vector<32x384xf32>, vector<8x384xf32> -> vector<8x384xf32>
    %51 = arith.addf %50, %14 : vector<8x384xf32>
    %52 = vector.extract_strided_slice %49 {offsets = [0, 0], sizes = [8, 32], strides = [1, 1]} : vector<8x384xf32> to vector<8x32xf32>
    %53 = vector.extract_strided_slice %51 {offsets = [0, 0], sizes = [8, 32], strides = [1, 1]} : vector<8x384xf32> to vector<8x32xf32>
    %54 = arith.addf %52, %53 : vector<8x32xf32>
    %55 = arith.negf %54 : vector<8x32xf32>
    %56 = math.exp %55 : vector<8x32xf32>
    %cst_28 = arith.constant 1.000000e+00 : f32
    %57 = vector.broadcast %cst_28 : f32 to vector<8x32xf32>
    %58 = arith.addf %57, %56 : vector<8x32xf32>
    %59 = arith.divf %57, %58 : vector<8x32xf32>
    %60 = vector.extract_strided_slice %49 {offsets = [0, 128], sizes = [8, 32], strides = [1, 1]} : vector<8x384xf32> to vector<8x32xf32>
    %61 = vector.extract_strided_slice %51 {offsets = [0, 128], sizes = [8, 32], strides = [1, 1]} : vector<8x384xf32> to vector<8x32xf32>
    %62 = arith.addf %60, %61 : vector<8x32xf32>
    %63 = arith.negf %62 : vector<8x32xf32>
    %64 = math.exp %63 : vector<8x32xf32>
    %cst_29 = arith.constant 1.000000e+00 : f32
    %65 = vector.broadcast %cst_29 : f32 to vector<8x32xf32>
    %66 = arith.addf %65, %64 : vector<8x32xf32>
    %67 = arith.divf %65, %66 : vector<8x32xf32>
    %68 = vector.extract_strided_slice %49 {offsets = [0, 256], sizes = [8, 32], strides = [1, 1]} : vector<8x384xf32> to vector<8x32xf32>
    %69 = vector.extract_strided_slice %51 {offsets = [0, 256], sizes = [8, 32], strides = [1, 1]} : vector<8x384xf32> to vector<8x32xf32>
    %70 = arith.mulf %59, %69 : vector<8x32xf32>
    %71 = arith.addf %68, %70 : vector<8x32xf32>
    %72 = math.tanh %71 : vector<8x32xf32>
    %73 = arith.subf %20, %72 : vector<8x32xf32>
    %74 = arith.mulf %67, %73 : vector<8x32xf32>
    %75 = arith.addf %72, %74 : vector<8x32xf32>
    %c8 = arith.constant 8 : index
    %c0_30 = arith.constant 0 : index
    %76 = vector.load %arg12[%c8, %c0_30] : memref<64x384xf32, #tpu.memory_space<vmem>>, vector<8x384xf32>
    %cst_31 = arith.constant dense<0.000000e+00> : vector<8x384xf32>
    %77 = tpu.matmul %47, %7, %cst_31 {dimension_numbers = #tpu.dot_dimension_numbers<[1], [0], [0], [1], [0, 0, 1, 1], [], []>} : vector<8x32xf32>, vector<32x384xf32>, vector<8x384xf32> -> vector<8x384xf32>
    %78 = arith.addf %77, %11 : vector<8x384xf32>
    %79 = vector.extract_strided_slice %76 {offsets = [0, 0], sizes = [8, 32], strides = [1, 1]} : vector<8x384xf32> to vector<8x32xf32>
    %80 = vector.extract_strided_slice %78 {offsets = [0, 0], sizes = [8, 32], strides = [1, 1]} : vector<8x384xf32> to vector<8x32xf32>
    %81 = arith.addf %79, %80 : vector<8x32xf32>
    %82 = arith.negf %81 : vector<8x32xf32>
    %83 = math.exp %82 : vector<8x32xf32>
    %cst_32 = arith.constant 1.000000e+00 : f32
    %84 = vector.broadcast %cst_32 : f32 to vector<8x32xf32>
    %85 = arith.addf %84, %83 : vector<8x32xf32>
    %86 = arith.divf %84, %85 : vector<8x32xf32>
    %87 = vector.extract_strided_slice %76 {offsets = [0, 128], sizes = [8, 32], strides = [1, 1]} : vector<8x384xf32> to vector<8x32xf32>
    %88 = vector.extract_strided_slice %78 {offsets = [0, 128], sizes = [8, 32], strides = [1, 1]} : vector<8x384xf32> to vector<8x32xf32>
    %89 = arith.addf %87, %88 : vector<8x32xf32>
    %90 = arith.negf %89 : vector<8x32xf32>
    %91 = math.exp %90 : vector<8x32xf32>
    %cst_33 = arith.constant 1.000000e+00 : f32
    %92 = vector.broadcast %cst_33 : f32 to vector<8x32xf32>
    %93 = arith.addf %92, %91 : vector<8x32xf32>
    %94 = arith.divf %92, %93 : vector<8x32xf32>
    %95 = vector.extract_strided_slice %76 {offsets = [0, 256], sizes = [8, 32], strides = [1, 1]} : vector<8x384xf32> to vector<8x32xf32>
    %96 = vector.extract_strided_slice %78 {offsets = [0, 256], sizes = [8, 32], strides = [1, 1]} : vector<8x384xf32> to vector<8x32xf32>
    %97 = arith.mulf %86, %96 : vector<8x32xf32>
    %98 = arith.addf %95, %97 : vector<8x32xf32>
    %99 = math.tanh %98 : vector<8x32xf32>
    %100 = arith.subf %47, %99 : vector<8x32xf32>
    %101 = arith.mulf %94, %100 : vector<8x32xf32>
    %102 = arith.addf %99, %101 : vector<8x32xf32>
    %cst_34 = arith.constant dense<0.000000e+00> : vector<8x384xf32>
    %103 = tpu.matmul %102, %15, %cst_34 {dimension_numbers = #tpu.dot_dimension_numbers<[1], [0], [0], [1], [0, 0, 1, 1], [], []>} : vector<8x32xf32>, vector<32x384xf32>, vector<8x384xf32> -> vector<8x384xf32>
    %104 = arith.addf %103, %18 : vector<8x384xf32>
    %cst_35 = arith.constant dense<0.000000e+00> : vector<8x384xf32>
    %105 = tpu.matmul %75, %8, %cst_35 {dimension_numbers = #tpu.dot_dimension_numbers<[1], [0], [0], [1], [0, 0, 1, 1], [], []>} : vector<8x32xf32>, vector<32x384xf32>, vector<8x384xf32> -> vector<8x384xf32>
    %106 = arith.addf %105, %14 : vector<8x384xf32>
    %107 = vector.extract_strided_slice %104 {offsets = [0, 0], sizes = [8, 32], strides = [1, 1]} : vector<8x384xf32> to vector<8x32xf32>
    %108 = vector.extract_strided_slice %106 {offsets = [0, 0], sizes = [8, 32], strides = [1, 1]} : vector<8x384xf32> to vector<8x32xf32>
    %109 = arith.addf %107, %108 : vector<8x32xf32>
    %110 = arith.negf %109 : vector<8x32xf32>
    %111 = math.exp %110 : vector<8x32xf32>
    %cst_36 = arith.constant 1.000000e+00 : f32
    %112 = vector.broadcast %cst_36 : f32 to vector<8x32xf32>
    %113 = arith.addf %112, %111 : vector<8x32xf32>
    %114 = arith.divf %112, %113 : vector<8x32xf32>
    %115 = vector.extract_strided_slice %104 {offsets = [0, 128], sizes = [8, 32], strides = [1, 1]} : vector<8x384xf32> to vector<8x32xf32>
    %116 = vector.extract_strided_slice %106 {offsets = [0, 128], sizes = [8, 32], strides = [1, 1]} : vector<8x384xf32> to vector<8x32xf32>
    %117 = arith.addf %115, %116 : vector<8x32xf32>
    %118 = arith.negf %117 : vector<8x32xf32>
    %119 = math.exp %118 : vector<8x32xf32>
    %cst_37 = arith.constant 1.000000e+00 : f32
    %120 = vector.broadcast %cst_37 : f32 to vector<8x32xf32>
    %121 = arith.addf %120, %119 : vector<8x32xf32>
    %122 = arith.divf %120, %121 : vector<8x32xf32>
    %123 = vector.extract_strided_slice %104 {offsets = [0, 256], sizes = [8, 32], strides = [1, 1]} : vector<8x384xf32> to vector<8x32xf32>
    %124 = vector.extract_strided_slice %106 {offsets = [0, 256], sizes = [8, 32], strides = [1, 1]} : vector<8x384xf32> to vector<8x32xf32>
    %125 = arith.mulf %114, %124 : vector<8x32xf32>
    %126 = arith.addf %123, %125 : vector<8x32xf32>
    %127 = math.tanh %126 : vector<8x32xf32>
    %128 = arith.subf %75, %127 : vector<8x32xf32>
    %129 = arith.mulf %122, %128 : vector<8x32xf32>
    %130 = arith.addf %127, %129 : vector<8x32xf32>
    %c16 = arith.constant 16 : index
    %c0_38 = arith.constant 0 : index
    %131 = vector.load %arg12[%c16, %c0_38] : memref<64x384xf32, #tpu.memory_space<vmem>>, vector<8x384xf32>
    %cst_39 = arith.constant dense<0.000000e+00> : vector<8x384xf32>
    %132 = tpu.matmul %102, %7, %cst_39 {dimension_numbers = #tpu.dot_dimension_numbers<[1], [0], [0], [1], [0, 0, 1, 1], [], []>} : vector<8x32xf32>, vector<32x384xf32>, vector<8x384xf32> -> vector<8x384xf32>
    %133 = arith.addf %132, %11 : vector<8x384xf32>
    %134 = vector.extract_strided_slice %131 {offsets = [0, 0], sizes = [8, 32], strides = [1, 1]} : vector<8x384xf32> to vector<8x32xf32>
    %135 = vector.extract_strided_slice %133 {offsets = [0, 0], sizes = [8, 32], strides = [1, 1]} : vector<8x384xf32> to vector<8x32xf32>
    %136 = arith.addf %134, %135 : vector<8x32xf32>
    %137 = arith.negf %136 : vector<8x32xf32>
    %138 = math.exp %137 : vector<8x32xf32>
    %cst_40 = arith.constant 1.000000e+00 : f32
    %139 = vector.broadcast %cst_40 : f32 to vector<8x32xf32>
    %140 = arith.addf %139, %138 : vector<8x32xf32>
    %141 = arith.divf %139, %140 : vector<8x32xf32>
    %142 = vector.extract_strided_slice %131 {offsets = [0, 128], sizes = [8, 32], strides = [1, 1]} : vector<8x384xf32> to vector<8x32xf32>
    %143 = vector.extract_strided_slice %133 {offsets = [0, 128], sizes = [8, 32], strides = [1, 1]} : vector<8x384xf32> to vector<8x32xf32>
    %144 = arith.addf %142, %143 : vector<8x32xf32>
    %145 = arith.negf %144 : vector<8x32xf32>
    %146 = math.exp %145 : vector<8x32xf32>
    %cst_41 = arith.constant 1.000000e+00 : f32
    %147 = vector.broadcast %cst_41 : f32 to vector<8x32xf32>
    %148 = arith.addf %147, %146 : vector<8x32xf32>
    %149 = arith.divf %147, %148 : vector<8x32xf32>
    %150 = vector.extract_strided_slice %131 {offsets = [0, 256], sizes = [8, 32], strides = [1, 1]} : vector<8x384xf32> to vector<8x32xf32>
    %151 = vector.extract_strided_slice %133 {offsets = [0, 256], sizes = [8, 32], strides = [1, 1]} : vector<8x384xf32> to vector<8x32xf32>
    %152 = arith.mulf %141, %151 : vector<8x32xf32>
    %153 = arith.addf %150, %152 : vector<8x32xf32>
    %154 = math.tanh %153 : vector<8x32xf32>
    %155 = arith.subf %102, %154 : vector<8x32xf32>
    %156 = arith.mulf %149, %155 : vector<8x32xf32>
    %157 = arith.addf %154, %156 : vector<8x32xf32>
    %cst_42 = arith.constant dense<0.000000e+00> : vector<8x384xf32>
    %158 = tpu.matmul %157, %15, %cst_42 {dimension_numbers = #tpu.dot_dimension_numbers<[1], [0], [0], [1], [0, 0, 1, 1], [], []>} : vector<8x32xf32>, vector<32x384xf32>, vector<8x384xf32> -> vector<8x384xf32>
    %159 = arith.addf %158, %18 : vector<8x384xf32>
    %cst_43 = arith.constant dense<0.000000e+00> : vector<8x384xf32>
    %160 = tpu.matmul %130, %8, %cst_43 {dimension_numbers = #tpu.dot_dimension_numbers<[1], [0], [0], [1], [0, 0, 1, 1], [], []>} : vector<8x32xf32>, vector<32x384xf32>, vector<8x384xf32> -> vector<8x384xf32>
    %161 = arith.addf %160, %14 : vector<8x384xf32>
    %162 = vector.extract_strided_slice %159 {offsets = [0, 0], sizes = [8, 32], strides = [1, 1]} : vector<8x384xf32> to vector<8x32xf32>
    %163 = vector.extract_strided_slice %161 {offsets = [0, 0], sizes = [8, 32], strides = [1, 1]} : vector<8x384xf32> to vector<8x32xf32>
    %164 = arith.addf %162, %163 : vector<8x32xf32>
    %165 = arith.negf %164 : vector<8x32xf32>
    %166 = math.exp %165 : vector<8x32xf32>
    %cst_44 = arith.constant 1.000000e+00 : f32
    %167 = vector.broadcast %cst_44 : f32 to vector<8x32xf32>
    %168 = arith.addf %167, %166 : vector<8x32xf32>
    %169 = arith.divf %167, %168 : vector<8x32xf32>
    %170 = vector.extract_strided_slice %159 {offsets = [0, 128], sizes = [8, 32], strides = [1, 1]} : vector<8x384xf32> to vector<8x32xf32>
    %171 = vector.extract_strided_slice %161 {offsets = [0, 128], sizes = [8, 32], strides = [1, 1]} : vector<8x384xf32> to vector<8x32xf32>
    %172 = arith.addf %170, %171 : vector<8x32xf32>
    %173 = arith.negf %172 : vector<8x32xf32>
    %174 = math.exp %173 : vector<8x32xf32>
    %cst_45 = arith.constant 1.000000e+00 : f32
    %175 = vector.broadcast %cst_45 : f32 to vector<8x32xf32>
    %176 = arith.addf %175, %174 : vector<8x32xf32>
    %177 = arith.divf %175, %176 : vector<8x32xf32>
    %178 = vector.extract_strided_slice %159 {offsets = [0, 256], sizes = [8, 32], strides = [1, 1]} : vector<8x384xf32> to vector<8x32xf32>
    %179 = vector.extract_strided_slice %161 {offsets = [0, 256], sizes = [8, 32], strides = [1, 1]} : vector<8x384xf32> to vector<8x32xf32>
    %180 = arith.mulf %169, %179 : vector<8x32xf32>
    %181 = arith.addf %178, %180 : vector<8x32xf32>
    %182 = math.tanh %181 : vector<8x32xf32>
    %183 = arith.subf %130, %182 : vector<8x32xf32>
    %184 = arith.mulf %177, %183 : vector<8x32xf32>
    %185 = arith.addf %182, %184 : vector<8x32xf32>
    %c24 = arith.constant 24 : index
    %c0_46 = arith.constant 0 : index
    %186 = vector.load %arg12[%c24, %c0_46] : memref<64x384xf32, #tpu.memory_space<vmem>>, vector<8x384xf32>
    %cst_47 = arith.constant dense<0.000000e+00> : vector<8x384xf32>
    %187 = tpu.matmul %157, %7, %cst_47 {dimension_numbers = #tpu.dot_dimension_numbers<[1], [0], [0], [1], [0, 0, 1, 1], [], []>} : vector<8x32xf32>, vector<32x384xf32>, vector<8x384xf32> -> vector<8x384xf32>
    %188 = arith.addf %187, %11 : vector<8x384xf32>
    %189 = vector.extract_strided_slice %186 {offsets = [0, 0], sizes = [8, 32], strides = [1, 1]} : vector<8x384xf32> to vector<8x32xf32>
    %190 = vector.extract_strided_slice %188 {offsets = [0, 0], sizes = [8, 32], strides = [1, 1]} : vector<8x384xf32> to vector<8x32xf32>
    %191 = arith.addf %189, %190 : vector<8x32xf32>
    %192 = arith.negf %191 : vector<8x32xf32>
    %193 = math.exp %192 : vector<8x32xf32>
    %cst_48 = arith.constant 1.000000e+00 : f32
    %194 = vector.broadcast %cst_48 : f32 to vector<8x32xf32>
    %195 = arith.addf %194, %193 : vector<8x32xf32>
    %196 = arith.divf %194, %195 : vector<8x32xf32>
    %197 = vector.extract_strided_slice %186 {offsets = [0, 128], sizes = [8, 32], strides = [1, 1]} : vector<8x384xf32> to vector<8x32xf32>
    %198 = vector.extract_strided_slice %188 {offsets = [0, 128], sizes = [8, 32], strides = [1, 1]} : vector<8x384xf32> to vector<8x32xf32>
    %199 = arith.addf %197, %198 : vector<8x32xf32>
    %200 = arith.negf %199 : vector<8x32xf32>
    %201 = math.exp %200 : vector<8x32xf32>
    %cst_49 = arith.constant 1.000000e+00 : f32
    %202 = vector.broadcast %cst_49 : f32 to vector<8x32xf32>
    %203 = arith.addf %202, %201 : vector<8x32xf32>
    %204 = arith.divf %202, %203 : vector<8x32xf32>
    %205 = vector.extract_strided_slice %186 {offsets = [0, 256], sizes = [8, 32], strides = [1, 1]} : vector<8x384xf32> to vector<8x32xf32>
    %206 = vector.extract_strided_slice %188 {offsets = [0, 256], sizes = [8, 32], strides = [1, 1]} : vector<8x384xf32> to vector<8x32xf32>
    %207 = arith.mulf %196, %206 : vector<8x32xf32>
    %208 = arith.addf %205, %207 : vector<8x32xf32>
    %209 = math.tanh %208 : vector<8x32xf32>
    %210 = arith.subf %157, %209 : vector<8x32xf32>
    %211 = arith.mulf %204, %210 : vector<8x32xf32>
    %212 = arith.addf %209, %211 : vector<8x32xf32>
    %cst_50 = arith.constant dense<0.000000e+00> : vector<8x384xf32>
    %213 = tpu.matmul %212, %15, %cst_50 {dimension_numbers = #tpu.dot_dimension_numbers<[1], [0], [0], [1], [0, 0, 1, 1], [], []>} : vector<8x32xf32>, vector<32x384xf32>, vector<8x384xf32> -> vector<8x384xf32>
    %214 = arith.addf %213, %18 : vector<8x384xf32>
    %cst_51 = arith.constant dense<0.000000e+00> : vector<8x384xf32>
    %215 = tpu.matmul %185, %8, %cst_51 {dimension_numbers = #tpu.dot_dimension_numbers<[1], [0], [0], [1], [0, 0, 1, 1], [], []>} : vector<8x32xf32>, vector<32x384xf32>, vector<8x384xf32> -> vector<8x384xf32>
    %216 = arith.addf %215, %14 : vector<8x384xf32>
    %217 = vector.extract_strided_slice %214 {offsets = [0, 0], sizes = [8, 32], strides = [1, 1]} : vector<8x384xf32> to vector<8x32xf32>
    %218 = vector.extract_strided_slice %216 {offsets = [0, 0], sizes = [8, 32], strides = [1, 1]} : vector<8x384xf32> to vector<8x32xf32>
    %219 = arith.addf %217, %218 : vector<8x32xf32>
    %220 = arith.negf %219 : vector<8x32xf32>
    %221 = math.exp %220 : vector<8x32xf32>
    %cst_52 = arith.constant 1.000000e+00 : f32
    %222 = vector.broadcast %cst_52 : f32 to vector<8x32xf32>
    %223 = arith.addf %222, %221 : vector<8x32xf32>
    %224 = arith.divf %222, %223 : vector<8x32xf32>
    %225 = vector.extract_strided_slice %214 {offsets = [0, 128], sizes = [8, 32], strides = [1, 1]} : vector<8x384xf32> to vector<8x32xf32>
    %226 = vector.extract_strided_slice %216 {offsets = [0, 128], sizes = [8, 32], strides = [1, 1]} : vector<8x384xf32> to vector<8x32xf32>
    %227 = arith.addf %225, %226 : vector<8x32xf32>
    %228 = arith.negf %227 : vector<8x32xf32>
    %229 = math.exp %228 : vector<8x32xf32>
    %cst_53 = arith.constant 1.000000e+00 : f32
    %230 = vector.broadcast %cst_53 : f32 to vector<8x32xf32>
    %231 = arith.addf %230, %229 : vector<8x32xf32>
    %232 = arith.divf %230, %231 : vector<8x32xf32>
    %233 = vector.extract_strided_slice %214 {offsets = [0, 256], sizes = [8, 32], strides = [1, 1]} : vector<8x384xf32> to vector<8x32xf32>
    %234 = vector.extract_strided_slice %216 {offsets = [0, 256], sizes = [8, 32], strides = [1, 1]} : vector<8x384xf32> to vector<8x32xf32>
    %235 = arith.mulf %224, %234 : vector<8x32xf32>
    %236 = arith.addf %233, %235 : vector<8x32xf32>
    %237 = math.tanh %236 : vector<8x32xf32>
    %238 = arith.subf %185, %237 : vector<8x32xf32>
    %239 = arith.mulf %232, %238 : vector<8x32xf32>
    %240 = arith.addf %237, %239 : vector<8x32xf32>
    %c32 = arith.constant 32 : index
    %c0_54 = arith.constant 0 : index
    %241 = vector.load %arg12[%c32, %c0_54] : memref<64x384xf32, #tpu.memory_space<vmem>>, vector<8x384xf32>
    %cst_55 = arith.constant dense<0.000000e+00> : vector<8x384xf32>
    %242 = tpu.matmul %212, %7, %cst_55 {dimension_numbers = #tpu.dot_dimension_numbers<[1], [0], [0], [1], [0, 0, 1, 1], [], []>} : vector<8x32xf32>, vector<32x384xf32>, vector<8x384xf32> -> vector<8x384xf32>
    %243 = arith.addf %242, %11 : vector<8x384xf32>
    %244 = vector.extract_strided_slice %241 {offsets = [0, 0], sizes = [8, 32], strides = [1, 1]} : vector<8x384xf32> to vector<8x32xf32>
    %245 = vector.extract_strided_slice %243 {offsets = [0, 0], sizes = [8, 32], strides = [1, 1]} : vector<8x384xf32> to vector<8x32xf32>
    %246 = arith.addf %244, %245 : vector<8x32xf32>
    %247 = arith.negf %246 : vector<8x32xf32>
    %248 = math.exp %247 : vector<8x32xf32>
    %cst_56 = arith.constant 1.000000e+00 : f32
    %249 = vector.broadcast %cst_56 : f32 to vector<8x32xf32>
    %250 = arith.addf %249, %248 : vector<8x32xf32>
    %251 = arith.divf %249, %250 : vector<8x32xf32>
    %252 = vector.extract_strided_slice %241 {offsets = [0, 128], sizes = [8, 32], strides = [1, 1]} : vector<8x384xf32> to vector<8x32xf32>
    %253 = vector.extract_strided_slice %243 {offsets = [0, 128], sizes = [8, 32], strides = [1, 1]} : vector<8x384xf32> to vector<8x32xf32>
    %254 = arith.addf %252, %253 : vector<8x32xf32>
    %255 = arith.negf %254 : vector<8x32xf32>
    %256 = math.exp %255 : vector<8x32xf32>
    %cst_57 = arith.constant 1.000000e+00 : f32
    %257 = vector.broadcast %cst_57 : f32 to vector<8x32xf32>
    %258 = arith.addf %257, %256 : vector<8x32xf32>
    %259 = arith.divf %257, %258 : vector<8x32xf32>
    %260 = vector.extract_strided_slice %241 {offsets = [0, 256], sizes = [8, 32], strides = [1, 1]} : vector<8x384xf32> to vector<8x32xf32>
    %261 = vector.extract_strided_slice %243 {offsets = [0, 256], sizes = [8, 32], strides = [1, 1]} : vector<8x384xf32> to vector<8x32xf32>
    %262 = arith.mulf %251, %261 : vector<8x32xf32>
    %263 = arith.addf %260, %262 : vector<8x32xf32>
    %264 = math.tanh %263 : vector<8x32xf32>
    %265 = arith.subf %212, %264 : vector<8x32xf32>
    %266 = arith.mulf %259, %265 : vector<8x32xf32>
    %267 = arith.addf %264, %266 : vector<8x32xf32>
    %cst_58 = arith.constant dense<0.000000e+00> : vector<8x384xf32>
    %268 = tpu.matmul %267, %15, %cst_58 {dimension_numbers = #tpu.dot_dimension_numbers<[1], [0], [0], [1], [0, 0, 1, 1], [], []>} : vector<8x32xf32>, vector<32x384xf32>, vector<8x384xf32> -> vector<8x384xf32>
    %269 = arith.addf %268, %18 : vector<8x384xf32>
    %cst_59 = arith.constant dense<0.000000e+00> : vector<8x384xf32>
    %270 = tpu.matmul %240, %8, %cst_59 {dimension_numbers = #tpu.dot_dimension_numbers<[1], [0], [0], [1], [0, 0, 1, 1], [], []>} : vector<8x32xf32>, vector<32x384xf32>, vector<8x384xf32> -> vector<8x384xf32>
    %271 = arith.addf %270, %14 : vector<8x384xf32>
    %272 = vector.extract_strided_slice %269 {offsets = [0, 0], sizes = [8, 32], strides = [1, 1]} : vector<8x384xf32> to vector<8x32xf32>
    %273 = vector.extract_strided_slice %271 {offsets = [0, 0], sizes = [8, 32], strides = [1, 1]} : vector<8x384xf32> to vector<8x32xf32>
    %274 = arith.addf %272, %273 : vector<8x32xf32>
    %275 = arith.negf %274 : vector<8x32xf32>
    %276 = math.exp %275 : vector<8x32xf32>
    %cst_60 = arith.constant 1.000000e+00 : f32
    %277 = vector.broadcast %cst_60 : f32 to vector<8x32xf32>
    %278 = arith.addf %277, %276 : vector<8x32xf32>
    %279 = arith.divf %277, %278 : vector<8x32xf32>
    %280 = vector.extract_strided_slice %269 {offsets = [0, 128], sizes = [8, 32], strides = [1, 1]} : vector<8x384xf32> to vector<8x32xf32>
    %281 = vector.extract_strided_slice %271 {offsets = [0, 128], sizes = [8, 32], strides = [1, 1]} : vector<8x384xf32> to vector<8x32xf32>
    %282 = arith.addf %280, %281 : vector<8x32xf32>
    %283 = arith.negf %282 : vector<8x32xf32>
    %284 = math.exp %283 : vector<8x32xf32>
    %cst_61 = arith.constant 1.000000e+00 : f32
    %285 = vector.broadcast %cst_61 : f32 to vector<8x32xf32>
    %286 = arith.addf %285, %284 : vector<8x32xf32>
    %287 = arith.divf %285, %286 : vector<8x32xf32>
    %288 = vector.extract_strided_slice %269 {offsets = [0, 256], sizes = [8, 32], strides = [1, 1]} : vector<8x384xf32> to vector<8x32xf32>
    %289 = vector.extract_strided_slice %271 {offsets = [0, 256], sizes = [8, 32], strides = [1, 1]} : vector<8x384xf32> to vector<8x32xf32>
    %290 = arith.mulf %279, %289 : vector<8x32xf32>
    %291 = arith.addf %288, %290 : vector<8x32xf32>
    %292 = math.tanh %291 : vector<8x32xf32>
    %293 = arith.subf %240, %292 : vector<8x32xf32>
    %294 = arith.mulf %287, %293 : vector<8x32xf32>
    %295 = arith.addf %292, %294 : vector<8x32xf32>
    %c40 = arith.constant 40 : index
    %c0_62 = arith.constant 0 : index
    %296 = vector.load %arg12[%c40, %c0_62] : memref<64x384xf32, #tpu.memory_space<vmem>>, vector<8x384xf32>
    %cst_63 = arith.constant dense<0.000000e+00> : vector<8x384xf32>
    %297 = tpu.matmul %267, %7, %cst_63 {dimension_numbers = #tpu.dot_dimension_numbers<[1], [0], [0], [1], [0, 0, 1, 1], [], []>} : vector<8x32xf32>, vector<32x384xf32>, vector<8x384xf32> -> vector<8x384xf32>
    %298 = arith.addf %297, %11 : vector<8x384xf32>
    %299 = vector.extract_strided_slice %296 {offsets = [0, 0], sizes = [8, 32], strides = [1, 1]} : vector<8x384xf32> to vector<8x32xf32>
    %300 = vector.extract_strided_slice %298 {offsets = [0, 0], sizes = [8, 32], strides = [1, 1]} : vector<8x384xf32> to vector<8x32xf32>
    %301 = arith.addf %299, %300 : vector<8x32xf32>
    %302 = arith.negf %301 : vector<8x32xf32>
    %303 = math.exp %302 : vector<8x32xf32>
    %cst_64 = arith.constant 1.000000e+00 : f32
    %304 = vector.broadcast %cst_64 : f32 to vector<8x32xf32>
    %305 = arith.addf %304, %303 : vector<8x32xf32>
    %306 = arith.divf %304, %305 : vector<8x32xf32>
    %307 = vector.extract_strided_slice %296 {offsets = [0, 128], sizes = [8, 32], strides = [1, 1]} : vector<8x384xf32> to vector<8x32xf32>
    %308 = vector.extract_strided_slice %298 {offsets = [0, 128], sizes = [8, 32], strides = [1, 1]} : vector<8x384xf32> to vector<8x32xf32>
    %309 = arith.addf %307, %308 : vector<8x32xf32>
    %310 = arith.negf %309 : vector<8x32xf32>
    %311 = math.exp %310 : vector<8x32xf32>
    %cst_65 = arith.constant 1.000000e+00 : f32
    %312 = vector.broadcast %cst_65 : f32 to vector<8x32xf32>
    %313 = arith.addf %312, %311 : vector<8x32xf32>
    %314 = arith.divf %312, %313 : vector<8x32xf32>
    %315 = vector.extract_strided_slice %296 {offsets = [0, 256], sizes = [8, 32], strides = [1, 1]} : vector<8x384xf32> to vector<8x32xf32>
    %316 = vector.extract_strided_slice %298 {offsets = [0, 256], sizes = [8, 32], strides = [1, 1]} : vector<8x384xf32> to vector<8x32xf32>
    %317 = arith.mulf %306, %316 : vector<8x32xf32>
    %318 = arith.addf %315, %317 : vector<8x32xf32>
    %319 = math.tanh %318 : vector<8x32xf32>
    %320 = arith.subf %267, %319 : vector<8x32xf32>
    %321 = arith.mulf %314, %320 : vector<8x32xf32>
    %322 = arith.addf %319, %321 : vector<8x32xf32>
    %cst_66 = arith.constant dense<0.000000e+00> : vector<8x384xf32>
    %323 = tpu.matmul %322, %15, %cst_66 {dimension_numbers = #tpu.dot_dimension_numbers<[1], [0], [0], [1], [0, 0, 1, 1], [], []>} : vector<8x32xf32>, vector<32x384xf32>, vector<8x384xf32> -> vector<8x384xf32>
    %324 = arith.addf %323, %18 : vector<8x384xf32>
    %cst_67 = arith.constant dense<0.000000e+00> : vector<8x384xf32>
    %325 = tpu.matmul %295, %8, %cst_67 {dimension_numbers = #tpu.dot_dimension_numbers<[1], [0], [0], [1], [0, 0, 1, 1], [], []>} : vector<8x32xf32>, vector<32x384xf32>, vector<8x384xf32> -> vector<8x384xf32>
    %326 = arith.addf %325, %14 : vector<8x384xf32>
    %327 = vector.extract_strided_slice %324 {offsets = [0, 0], sizes = [8, 32], strides = [1, 1]} : vector<8x384xf32> to vector<8x32xf32>
    %328 = vector.extract_strided_slice %326 {offsets = [0, 0], sizes = [8, 32], strides = [1, 1]} : vector<8x384xf32> to vector<8x32xf32>
    %329 = arith.addf %327, %328 : vector<8x32xf32>
    %330 = arith.negf %329 : vector<8x32xf32>
    %331 = math.exp %330 : vector<8x32xf32>
    %cst_68 = arith.constant 1.000000e+00 : f32
    %332 = vector.broadcast %cst_68 : f32 to vector<8x32xf32>
    %333 = arith.addf %332, %331 : vector<8x32xf32>
    %334 = arith.divf %332, %333 : vector<8x32xf32>
    %335 = vector.extract_strided_slice %324 {offsets = [0, 128], sizes = [8, 32], strides = [1, 1]} : vector<8x384xf32> to vector<8x32xf32>
    %336 = vector.extract_strided_slice %326 {offsets = [0, 128], sizes = [8, 32], strides = [1, 1]} : vector<8x384xf32> to vector<8x32xf32>
    %337 = arith.addf %335, %336 : vector<8x32xf32>
    %338 = arith.negf %337 : vector<8x32xf32>
    %339 = math.exp %338 : vector<8x32xf32>
    %cst_69 = arith.constant 1.000000e+00 : f32
    %340 = vector.broadcast %cst_69 : f32 to vector<8x32xf32>
    %341 = arith.addf %340, %339 : vector<8x32xf32>
    %342 = arith.divf %340, %341 : vector<8x32xf32>
    %343 = vector.extract_strided_slice %324 {offsets = [0, 256], sizes = [8, 32], strides = [1, 1]} : vector<8x384xf32> to vector<8x32xf32>
    %344 = vector.extract_strided_slice %326 {offsets = [0, 256], sizes = [8, 32], strides = [1, 1]} : vector<8x384xf32> to vector<8x32xf32>
    %345 = arith.mulf %334, %344 : vector<8x32xf32>
    %346 = arith.addf %343, %345 : vector<8x32xf32>
    %347 = math.tanh %346 : vector<8x32xf32>
    %348 = arith.subf %295, %347 : vector<8x32xf32>
    %349 = arith.mulf %342, %348 : vector<8x32xf32>
    %350 = arith.addf %347, %349 : vector<8x32xf32>
    %c48 = arith.constant 48 : index
    %c0_70 = arith.constant 0 : index
    %351 = vector.load %arg12[%c48, %c0_70] : memref<64x384xf32, #tpu.memory_space<vmem>>, vector<8x384xf32>
    %cst_71 = arith.constant dense<0.000000e+00> : vector<8x384xf32>
    %352 = tpu.matmul %322, %7, %cst_71 {dimension_numbers = #tpu.dot_dimension_numbers<[1], [0], [0], [1], [0, 0, 1, 1], [], []>} : vector<8x32xf32>, vector<32x384xf32>, vector<8x384xf32> -> vector<8x384xf32>
    %353 = arith.addf %352, %11 : vector<8x384xf32>
    %354 = vector.extract_strided_slice %351 {offsets = [0, 0], sizes = [8, 32], strides = [1, 1]} : vector<8x384xf32> to vector<8x32xf32>
    %355 = vector.extract_strided_slice %353 {offsets = [0, 0], sizes = [8, 32], strides = [1, 1]} : vector<8x384xf32> to vector<8x32xf32>
    %356 = arith.addf %354, %355 : vector<8x32xf32>
    %357 = arith.negf %356 : vector<8x32xf32>
    %358 = math.exp %357 : vector<8x32xf32>
    %cst_72 = arith.constant 1.000000e+00 : f32
    %359 = vector.broadcast %cst_72 : f32 to vector<8x32xf32>
    %360 = arith.addf %359, %358 : vector<8x32xf32>
    %361 = arith.divf %359, %360 : vector<8x32xf32>
    %362 = vector.extract_strided_slice %351 {offsets = [0, 128], sizes = [8, 32], strides = [1, 1]} : vector<8x384xf32> to vector<8x32xf32>
    %363 = vector.extract_strided_slice %353 {offsets = [0, 128], sizes = [8, 32], strides = [1, 1]} : vector<8x384xf32> to vector<8x32xf32>
    %364 = arith.addf %362, %363 : vector<8x32xf32>
    %365 = arith.negf %364 : vector<8x32xf32>
    %366 = math.exp %365 : vector<8x32xf32>
    %cst_73 = arith.constant 1.000000e+00 : f32
    %367 = vector.broadcast %cst_73 : f32 to vector<8x32xf32>
    %368 = arith.addf %367, %366 : vector<8x32xf32>
    %369 = arith.divf %367, %368 : vector<8x32xf32>
    %370 = vector.extract_strided_slice %351 {offsets = [0, 256], sizes = [8, 32], strides = [1, 1]} : vector<8x384xf32> to vector<8x32xf32>
    %371 = vector.extract_strided_slice %353 {offsets = [0, 256], sizes = [8, 32], strides = [1, 1]} : vector<8x384xf32> to vector<8x32xf32>
    %372 = arith.mulf %361, %371 : vector<8x32xf32>
    %373 = arith.addf %370, %372 : vector<8x32xf32>
    %374 = math.tanh %373 : vector<8x32xf32>
    %375 = arith.subf %322, %374 : vector<8x32xf32>
    %376 = arith.mulf %369, %375 : vector<8x32xf32>
    %377 = arith.addf %374, %376 : vector<8x32xf32>
    %cst_74 = arith.constant dense<0.000000e+00> : vector<8x384xf32>
    %378 = tpu.matmul %377, %15, %cst_74 {dimension_numbers = #tpu.dot_dimension_numbers<[1], [0], [0], [1], [0, 0, 1, 1], [], []>} : vector<8x32xf32>, vector<32x384xf32>, vector<8x384xf32> -> vector<8x384xf32>
    %379 = arith.addf %378, %18 : vector<8x384xf32>
    %cst_75 = arith.constant dense<0.000000e+00> : vector<8x384xf32>
    %380 = tpu.matmul %350, %8, %cst_75 {dimension_numbers = #tpu.dot_dimension_numbers<[1], [0], [0], [1], [0, 0, 1, 1], [], []>} : vector<8x32xf32>, vector<32x384xf32>, vector<8x384xf32> -> vector<8x384xf32>
    %381 = arith.addf %380, %14 : vector<8x384xf32>
    %382 = vector.extract_strided_slice %379 {offsets = [0, 0], sizes = [8, 32], strides = [1, 1]} : vector<8x384xf32> to vector<8x32xf32>
    %383 = vector.extract_strided_slice %381 {offsets = [0, 0], sizes = [8, 32], strides = [1, 1]} : vector<8x384xf32> to vector<8x32xf32>
    %384 = arith.addf %382, %383 : vector<8x32xf32>
    %385 = arith.negf %384 : vector<8x32xf32>
    %386 = math.exp %385 : vector<8x32xf32>
    %cst_76 = arith.constant 1.000000e+00 : f32
    %387 = vector.broadcast %cst_76 : f32 to vector<8x32xf32>
    %388 = arith.addf %387, %386 : vector<8x32xf32>
    %389 = arith.divf %387, %388 : vector<8x32xf32>
    %390 = vector.extract_strided_slice %379 {offsets = [0, 128], sizes = [8, 32], strides = [1, 1]} : vector<8x384xf32> to vector<8x32xf32>
    %391 = vector.extract_strided_slice %381 {offsets = [0, 128], sizes = [8, 32], strides = [1, 1]} : vector<8x384xf32> to vector<8x32xf32>
    %392 = arith.addf %390, %391 : vector<8x32xf32>
    %393 = arith.negf %392 : vector<8x32xf32>
    %394 = math.exp %393 : vector<8x32xf32>
    %cst_77 = arith.constant 1.000000e+00 : f32
    %395 = vector.broadcast %cst_77 : f32 to vector<8x32xf32>
    %396 = arith.addf %395, %394 : vector<8x32xf32>
    %397 = arith.divf %395, %396 : vector<8x32xf32>
    %398 = vector.extract_strided_slice %379 {offsets = [0, 256], sizes = [8, 32], strides = [1, 1]} : vector<8x384xf32> to vector<8x32xf32>
    %399 = vector.extract_strided_slice %381 {offsets = [0, 256], sizes = [8, 32], strides = [1, 1]} : vector<8x384xf32> to vector<8x32xf32>
    %400 = arith.mulf %389, %399 : vector<8x32xf32>
    %401 = arith.addf %398, %400 : vector<8x32xf32>
    %402 = math.tanh %401 : vector<8x32xf32>
    %403 = arith.subf %350, %402 : vector<8x32xf32>
    %404 = arith.mulf %397, %403 : vector<8x32xf32>
    %405 = arith.addf %402, %404 : vector<8x32xf32>
    %c56 = arith.constant 56 : index
    %c0_78 = arith.constant 0 : index
    %406 = vector.load %arg12[%c56, %c0_78] : memref<64x384xf32, #tpu.memory_space<vmem>>, vector<8x384xf32>
    %cst_79 = arith.constant dense<0.000000e+00> : vector<8x384xf32>
    %407 = tpu.matmul %377, %7, %cst_79 {dimension_numbers = #tpu.dot_dimension_numbers<[1], [0], [0], [1], [0, 0, 1, 1], [], []>} : vector<8x32xf32>, vector<32x384xf32>, vector<8x384xf32> -> vector<8x384xf32>
    %408 = arith.addf %407, %11 : vector<8x384xf32>
    %409 = vector.extract_strided_slice %406 {offsets = [0, 0], sizes = [8, 32], strides = [1, 1]} : vector<8x384xf32> to vector<8x32xf32>
    %410 = vector.extract_strided_slice %408 {offsets = [0, 0], sizes = [8, 32], strides = [1, 1]} : vector<8x384xf32> to vector<8x32xf32>
    %411 = arith.addf %409, %410 : vector<8x32xf32>
    %412 = arith.negf %411 : vector<8x32xf32>
    %413 = math.exp %412 : vector<8x32xf32>
    %cst_80 = arith.constant 1.000000e+00 : f32
    %414 = vector.broadcast %cst_80 : f32 to vector<8x32xf32>
    %415 = arith.addf %414, %413 : vector<8x32xf32>
    %416 = arith.divf %414, %415 : vector<8x32xf32>
    %417 = vector.extract_strided_slice %406 {offsets = [0, 128], sizes = [8, 32], strides = [1, 1]} : vector<8x384xf32> to vector<8x32xf32>
    %418 = vector.extract_strided_slice %408 {offsets = [0, 128], sizes = [8, 32], strides = [1, 1]} : vector<8x384xf32> to vector<8x32xf32>
    %419 = arith.addf %417, %418 : vector<8x32xf32>
    %420 = arith.negf %419 : vector<8x32xf32>
    %421 = math.exp %420 : vector<8x32xf32>
    %cst_81 = arith.constant 1.000000e+00 : f32
    %422 = vector.broadcast %cst_81 : f32 to vector<8x32xf32>
    %423 = arith.addf %422, %421 : vector<8x32xf32>
    %424 = arith.divf %422, %423 : vector<8x32xf32>
    %425 = vector.extract_strided_slice %406 {offsets = [0, 256], sizes = [8, 32], strides = [1, 1]} : vector<8x384xf32> to vector<8x32xf32>
    %426 = vector.extract_strided_slice %408 {offsets = [0, 256], sizes = [8, 32], strides = [1, 1]} : vector<8x384xf32> to vector<8x32xf32>
    %427 = arith.mulf %416, %426 : vector<8x32xf32>
    %428 = arith.addf %425, %427 : vector<8x32xf32>
    %429 = math.tanh %428 : vector<8x32xf32>
    %430 = arith.subf %377, %429 : vector<8x32xf32>
    %431 = arith.mulf %424, %430 : vector<8x32xf32>
    %432 = arith.addf %429, %431 : vector<8x32xf32>
    %cst_82 = arith.constant dense<0.000000e+00> : vector<8x384xf32>
    %433 = tpu.matmul %432, %15, %cst_82 {dimension_numbers = #tpu.dot_dimension_numbers<[1], [0], [0], [1], [0, 0, 1, 1], [], []>} : vector<8x32xf32>, vector<32x384xf32>, vector<8x384xf32> -> vector<8x384xf32>
    %434 = arith.addf %433, %18 : vector<8x384xf32>
    %cst_83 = arith.constant dense<0.000000e+00> : vector<8x384xf32>
    %435 = tpu.matmul %405, %8, %cst_83 {dimension_numbers = #tpu.dot_dimension_numbers<[1], [0], [0], [1], [0, 0, 1, 1], [], []>} : vector<8x32xf32>, vector<32x384xf32>, vector<8x384xf32> -> vector<8x384xf32>
    %436 = arith.addf %435, %14 : vector<8x384xf32>
    %437 = vector.extract_strided_slice %434 {offsets = [0, 0], sizes = [8, 32], strides = [1, 1]} : vector<8x384xf32> to vector<8x32xf32>
    %438 = vector.extract_strided_slice %436 {offsets = [0, 0], sizes = [8, 32], strides = [1, 1]} : vector<8x384xf32> to vector<8x32xf32>
    %439 = arith.addf %437, %438 : vector<8x32xf32>
    %440 = arith.negf %439 : vector<8x32xf32>
    %441 = math.exp %440 : vector<8x32xf32>
    %cst_84 = arith.constant 1.000000e+00 : f32
    %442 = vector.broadcast %cst_84 : f32 to vector<8x32xf32>
    %443 = arith.addf %442, %441 : vector<8x32xf32>
    %444 = arith.divf %442, %443 : vector<8x32xf32>
    %445 = vector.extract_strided_slice %434 {offsets = [0, 128], sizes = [8, 32], strides = [1, 1]} : vector<8x384xf32> to vector<8x32xf32>
    %446 = vector.extract_strided_slice %436 {offsets = [0, 128], sizes = [8, 32], strides = [1, 1]} : vector<8x384xf32> to vector<8x32xf32>
    %447 = arith.addf %445, %446 : vector<8x32xf32>
    %448 = arith.negf %447 : vector<8x32xf32>
    %449 = math.exp %448 : vector<8x32xf32>
    %cst_85 = arith.constant 1.000000e+00 : f32
    %450 = vector.broadcast %cst_85 : f32 to vector<8x32xf32>
    %451 = arith.addf %450, %449 : vector<8x32xf32>
    %452 = arith.divf %450, %451 : vector<8x32xf32>
    %453 = vector.extract_strided_slice %434 {offsets = [0, 256], sizes = [8, 32], strides = [1, 1]} : vector<8x384xf32> to vector<8x32xf32>
    %454 = vector.extract_strided_slice %436 {offsets = [0, 256], sizes = [8, 32], strides = [1, 1]} : vector<8x384xf32> to vector<8x32xf32>
    %455 = arith.mulf %444, %454 : vector<8x32xf32>
    %456 = arith.addf %453, %455 : vector<8x32xf32>
    %457 = math.tanh %456 : vector<8x32xf32>
    %458 = arith.subf %405, %457 : vector<8x32xf32>
    %459 = arith.mulf %452, %458 : vector<8x32xf32>
    %460 = arith.addf %457, %459 : vector<8x32xf32>
    %c0_86 = arith.constant 0 : index
    %c0_87 = arith.constant 0 : index
    %461 = vector.load %arg9[%c0_86, %c0_87] : memref<32x3xf32, #tpu.memory_space<vmem>>, vector<32x3xf32>
    %cst_88 = arith.constant dense<0.000000e+00> : vector<8x3xf32>
    %462 = tpu.matmul %460, %461, %cst_88 {dimension_numbers = #tpu.dot_dimension_numbers<[1], [0], [0], [1], [0, 0, 1, 1], [], []>} : vector<8x32xf32>, vector<32x3xf32>, vector<8x3xf32> -> vector<8x3xf32>
    %c0_89 = arith.constant 0 : index
    %c0_90 = arith.constant 0 : index
    %463 = vector.load %arg10[%c0_89, %c0_90] : memref<1x3xf32, #tpu.memory_space<vmem>>, vector<1x3xf32>
    %464 = vector.broadcast %463 : vector<1x3xf32> to vector<8x3xf32>
    %465 = arith.addf %462, %464 : vector<8x3xf32>
    %c0_91 = arith.constant 0 : index
    %c0_92 = arith.constant 0 : index
    %466 = vector.load %arg11[%c0_91, %c0_92] : memref<8x3xf32, #tpu.memory_space<vmem>>, vector<8x3xf32>
    tpu.vector_store %arg11[%c0_91, %c0_92], %465 {strides = array<i32>} : memref<8x3xf32, #tpu.memory_space<vmem>>, vector<8x3xf32>,
    return
  }
}

</mosaic_0001>

<bundles_post_ra>
// kernel: tpu_custom_call.1
= control target key start
LH: loop header
LB: loop body
LE: loop exit
PB: predicated region body
PF: predicated region fallthrough
CT: control target
= control target key end

     0   :  { %16 = vsyncpa [#allocation4], 0  ;;  %s6280_s0 = inlined_call_operand.vmem [shape: f32[64,4], index: 0, kind: input, shape index: {}]   ;;  %s6281_s1 = inlined_call_operand.vmem [shape: f32[4,384], index: 1, kind: input, shape index: {}]   ;;  %s6282_s2 = inlined_call_operand.vmem [shape: f32[32,384], index: 2, kind: input, shape index: {}]   ;;  %s6283_s3 = inlined_call_operand.vmem [shape: f32[1,384], index: 3, kind: input, shape index: {}]   ;;  %s6284_s4 = inlined_call_operand.vmem [shape: f32[1,384], index: 4, kind: input, shape index: {}]   ;;  %s6285_s5 = inlined_call_operand.hbm [shape: f32[32,384], index: 5, kind: input, shape index: {}]   ;;  %s6286_s6 = inlined_call_operand.hbm [shape: f32[32,384], index: 6, kind: input, shape index: {}]   ;;  %s6287_s7 = inlined_call_operand.vmem [shape: f32[1,384], index: 7, kind: input, shape index: {}]   ;;  %s6288_s8 = inlined_call_operand.vmem [shape: f32[1,384], index: 8, kind: input, shape index: {}]   ;;  %s6289_s9 = inlined_call_operand.vmem [shape: f32[32,3], index: 9, kind: input, shape index: {}]   ;;  %s6290_s10 = inlined_call_operand.vmem [shape: f32[1,3], index: 10, kind: input, shape index: {}]   ;;  %s6291_s11 = inlined_call_operand.vmem [shape: f32[8,3], index: 11, kind: output, shape index: {}]  }
   0x1   :  { %17 = vsyncpa [#allocation6], 0  ;;  %s5502_s17 = smov [#allocation3]   ;;  %s5454_s21 = scalar_lea.hbm %s6285_s5, 1536 }
   0x2   :  { %s33_s18 = sshll.u32 %s5502_s17, 4  ;;  %p5455_p0 = scmp.ne.s32.totalorder %s6285_s5, %s5454_s21  ;;  %s34_s18 = int_to_ptr.vmem [resolvable:$true] %s33_s18 }
   0x3   :  { %p5458_p1 = scmp.lt.u32.totalorder %s5454_s21, %s6285_s5 }
   0x5   :  { %p5460_p2 = pnand %p5458_p1, %p5455_p0 }
   0x7   :  { %5463 = shalt.err (!%p5460_p2)
}
   0x8   :  { %s5464_s26 = scalar_lea.vmem %s34_s18, 1536  ;;  %p5469_p4 = scmp.lt.s32.totalorder %s34_s18, %s34_s18 }
   0x9   :  { %p5465_p3 = scmp.ne.s32.totalorder %s34_s18, %s5464_s26  ;;  %p5470_p5 = scmp.lt.s32.totalorder %s5464_s26, %s5464_s26 }
   0xb   :  { %p5471_p6 = por %p5470_p5, %p5469_p4 }
   0xd   :  { %p5472_p7 = pnand %p5471_p6, %p5465_p3 }
   0xf   :  { %5475 = shalt.err (!%p5472_p7)
}
  0x10   :  { %s5503_s27 = smov 384   ;;  %s5504_s28 = smov 24  }
  0x11   :  { %39 = dma.hbm_to_vmem [thread:$0]  %s6285_s5, 1536, %s34_s18, [#allocation4], %s5503_s27, %s5503_s27, %s5504_s28  }
  0x12   :  { %s5505_s12 = smov [#allocation5]   ;;  %s5476_s16 = scalar_lea.hbm %s6286_s6, 1536 }
  0x13   :  { %s45_s13 = sshll.u32 %s5505_s12, 4  ;;  %p5477_p8 = scmp.ne.s32.totalorder %s6286_s6, %s5476_s16  ;;  %s46_s13 = int_to_ptr.vmem [resolvable:$true] %s45_s13 }
  0x14   :  { %p5480_p9 = scmp.lt.u32.totalorder %s5476_s16, %s6286_s6 }
  0x16   :  { %p5482_p10 = pnand %p5480_p9, %p5477_p8 }
  0x18   :  { %5485 = shalt.err (!%p5482_p10)
}
  0x19   :  { %s5486_s22 = scalar_lea.vmem %s46_s13, 1536  ;;  %p5491_p12 = scmp.lt.s32.totalorder %s46_s13, %s46_s13 }
  0x1a   :  { %p5487_p11 = scmp.ne.s32.totalorder %s46_s13, %s5486_s22  ;;  %p5492_p13 = scmp.lt.s32.totalorder %s5486_s22, %s5486_s22 }
  0x1c   :  { %p5493_p0 = por %p5492_p13, %p5491_p12 }
  0x1e   :  { %p5494_p1 = pnand %p5493_p0, %p5487_p11 }
  0x20   :  { %5497 = shalt.err (!%p5494_p1)
}
  0x21   :  { %51 = dma.hbm_to_vmem [thread:$0]  %s6286_s6, 1536, %s46_s13, [#allocation6], %s5503_s27, %s5503_s27, %s5504_s28  }
  0x22   :  { %5498 = dma.done.wait [#allocation4], 1536  }
  0x23   :  { %5499 = vsyncadd [#allocation4], 4294965760 }
  0x24   :  { %5500 = dma.done.wait [#allocation6], 1536  }
  0x25   :  { %5501 = vsyncadd [#allocation6], 4294965760  ;;  %v5506_v0 = vmov 0.0   ;;  %v74_v1 = vld [vmem:[%s6281_s1] sm:$0xff]  ;;  %vm121_vm0 = vcmask 1043456   ;;  %v371_v2 = vld [vmem:[%s6282_s2 + $0x8] sm:$0xff]  ;;  %v78_v49 = vlaneseq }
  0x26   :  { %192 = vmatprep.mubr.f32.mxu0 %v5506_v0  ;;  %234 = vmatprep.mubr.f32.mxu1 %v5506_v0  ;;  %v95_v3 = vcombine.high %v74_v1, %v74_v1  ;;  %v374_v4 = vld [vmem:[%s6282_s2 + $0x20] sm:$0xff]  ;;  %v373_v6 = vld [vmem:[%s6282_s2 + $0x18] sm:$0xff]  ;;  %vm96_vm1 = vcmask 31744   ;;  %v380_v11 = vld [vmem:[%s6282_s2 + $0x50] sm:$0xff]  ;;  %v5507_v25 = vmov 0.0|0.0   ;;  %vm5508_vm2 = vmmov 0  }
  0x27   :  { %v370_v5 = vld [vmem:[%s6282_s2] sm:$0xff]  ;;  %v5613_v8 = vpack.c.bf16 %v374_v4, %v371_v2  ;;  %v377_v10 = vld [vmem:[%s6282_s2 + $0x38] sm:$0xff]  ;;  %v376_v12 = vld [vmem:[%s6282_s2 + $0x30] sm:$0xff]  ;;  %v79_v50 = vshrl.u32 %v78_v49, 7  ;;  %vm460_vm3 = vcmask 261120   ;;  %vm4318_vm4 = vcmask 23552  }
  0x28   :  { %v66_v7 = vld [vmem:[%s6280_s0] sm:$0xff]  ;;  %v5615_v9 = vpack.c.bf16 %v373_v6, %v370_v5  ;;  %4326 = vmatprep.subr.msk.mxu0 %vm121_vm0, %v95_v3  ;;  %5188 = vmatprep.subr.msk.mxu1 %vm121_vm0, %v95_v3  ;;  %v5629_v13 = vpack.c.bf16 %v380_v11, %v377_v10  ;;  %v379_v14 = vld [vmem:[%s6282_s2 + $0x48] sm:$0xff]  ;;  %v73_v15 = vld [vmem:[%s6280_s0 + $0x38] sm:$0xff] }
  0x29   :  { %4327 = vmatpush1.msk.msra.mxu0 %vm121_vm0, %v74_v1  ;;  %5189 = vmatpush1.msk.msra.mxu1 %vm121_vm0, %v74_v1  ;;  %v75_v16 = vld [vmem:[%s6281_s1 + $0x8] sm:$0xf]  ;;  %v5648_v18 = vpack.c.bf16 %v379_v14, %v376_v12  ;;  %v372_v19 = vld [vmem:[%s6282_s2 + $0x10] sm:$0xff]  ;;  %v378_v22 = vld [vmem:[%s6282_s2 + $0x40] sm:$0xff]  ;;  %v5745_v51 = vsub.s32 2, %v79_v50  ;;  %v5765_v4 = vsub.s32 0, %v79_v50 }
  0x2a   :  { %4328 = vmatmul.mubr.msk.f32.vlgmr.msra.gmra.mrb[0].mxu0 %vm96_vm1, %v66_v7  ;;  %4847 = vmatprep.subr.bf16.mxu0 %v5613_v8  ;;  %v67_v17 = vld [vmem:[%s6280_s0 + $0x8] sm:$0xff]  ;;  %v381_v23 = vld [vmem:[%s6282_s2 + $0x58] sm:$0xff]  ;;  %v68_v24 = vld [vmem:[%s6280_s0 + $0x10] sm:$0xff] }
  0x2b   :  { %4849 = vmatpush1.bf16.msra.mxu0 %v5615_v9  ;;  %198 = vmatprep.mubr.f32.mxu0 %v5506_v0  ;;  %v375_v20 = vld [vmem:[%s6282_s2 + $0x28] sm:$0xff]  ;;  %v5679_v26 = vpack.c.bf16 %v381_v23, %v378_v22  ;;  %v69_v27 = vld [vmem:[%s6280_s0 + $0x18] sm:$0xff]  ;;  %v70_v28 = vld [vmem:[%s6280_s0 + $0x20] sm:$0xff] }
  0x2c   :  { %4851 = vmatprep.subr.bf16.mxu0 %v5629_v13  ;;  %4335 = vmatmul.mubr.msk.f32.vlgmr.msra.gmra.mrb[0].mxu1 %vm96_vm1, %v73_v15  ;;  %v5660_v21 = vpack.c.bf16 %v375_v20, %v372_v19  ;;  %v71_v29 = vld [vmem:[%s6280_s0 + $0x28] sm:$0xff]  ;;  %v72_v30 = vld [vmem:[%s6280_s0 + $0x30] sm:$0xff]  ;;  %v390_v34 = vld [vmem:[#allocation5 + $0x40] sm:$0xff]  ;;  %v5784_v19 = vsub.s32 1, %v79_v50 }
  0x2d   :  { %4557 = vmatprep.subr.msk.mxu1 %vm121_vm0, %v75_v16  ;;  %4559 = vmatprep.mubr.msk.f32.mxu1 %vm96_vm1, %v66_v7  ;;  %v384_v31 = vld [vmem:[#allocation5 + $0x10] sm:$0xff]  ;;  %v387_v32 = vld [vmem:[#allocation5 + $0x28] sm:$0xff]  ;;  %v393_v35 = vld [vmem:[#allocation5 + $0x58] sm:$0xff] }
  0x2e   :  { %4329 = vmatmul.mubr.msk.f32.gmra.mrb[2].mxu0 %vm96_vm1, %v67_v17  ;;  %4558 = vmatpush3.msk.msra.mxu1 %vm121_vm0, %v75_v16  ;;  %v5718_v33 = vpack.c.bf16 %v387_v32, %v384_v31  ;;  %v429_v36 = vld [vmem:[#allocation3 + $0x8] sm:$0xff]  ;;  %v432_v37 = vld [vmem:[#allocation3 + $0x20] sm:$0xff]  ;;  %v431_v39 = vld [vmem:[#allocation3 + $0x18] sm:$0xff]  ;;  %v5721_v40 = vpack.c.bf16 %v393_v35, %v390_v34 }
  0x2f   :  { %204 = vmatprep.mubr.f32.mxu0 %v5506_v0  ;;  %4853 = vmatpush1.bf16.msra.mxu0 %v5648_v18  ;;  %v428_v38 = vld [vmem:[#allocation3] sm:$0xff]  ;;  %v5723_v41 = vpack.c.bf16 %v432_v37, %v429_v36  ;;  %v435_v43 = vld [vmem:[#allocation3 + $0x38] sm:$0xff]  ;;  %v438_v44 = vld [vmem:[#allocation3 + $0x50] sm:$0xff] }
  0x30   :  { %4560 = vmatmul.mubr.msk.f32.vlgmr.msra.gmra.mrb[2].mxu1 %vm96_vm1, %v67_v17  ;;  %4854 = vmatprep.subr.bf16.mxu1 %v5507_v25  ;;  %v5725_v42 = vpack.c.bf16 %v431_v39, %v428_v38  ;;  %v434_v45 = vld [vmem:[#allocation3 + $0x30] sm:$0xff]  ;;  %v5728_v46 = vpack.c.bf16 %v438_v44, %v435_v43  ;;  %v437_v47 = vld [vmem:[#allocation3 + $0x48] sm:$0xff]  ;;  %v76_v52 = vld [vmem:[%s6283_s3] sm:$0x7] }
  0x31   :  { %4856 = vmatpush3.bf16.msra.mxu1 %v5660_v21  ;;  %4562 = vmatprep.mubr.msk.f32.mxu1 %vm96_vm1, %v68_v24  ;;  %v5732_v48 = vpack.c.bf16 %v437_v47, %v434_v45  ;;  %v89_v54 = vrot.slane %v76_v52, %v5745_v51  ;;  %v394_v5 = vld [vmem:[%s6284_s4] sm:$0x7]  ;;  %v5775_v12 = vrot.slane %v76_v52, %v5765_v4  ;;  %v430_v50 = vld [vmem:[#allocation3 + $0x10] sm:$0xff] }
  0x32   :  { %4330 = vmatmul.mubr.msk.f32.gmra.mrb[4].mxu0 %vm96_vm1, %v68_v24  ;;  %4857 = vmatprep.subr.bf16.mxu1 %v5507_v25  ;;  %v5778_v14 = vrot.slane %v394_v5, %v5765_v4  ;;  %v5788_v23 = vrot.slane %v76_v52, %v5784_v19  ;;  %v5791_v24 = vrot.slane %v394_v5, %v5784_v19  ;;  %v433_v52 = vld [vmem:[#allocation3 + $0x28] sm:$0xff] }
  0x33   :  { %210 = vmatprep.mubr.f32.mxu0 %v5506_v0  ;;  %4882 = vmatprep.subr.bf16.mxu0 %v5507_v25  ;;  %v5799_v35 = vrot.slane %v394_v5, %v5745_v51  ;;  %v439_v5 = vld [vmem:[#allocation3 + $0x58] sm:$0xff] }
  0x34   :  { %4563 = vmatmul.mubr.msk.f32.gmra.mrb[4].mxu1 %vm96_vm1, %v69_v27  ;;  %v5782_v17 = vadd.f32 %v5778_v14, %v5775_v12 }
  0x35   :  { %4565 = vmatprep.mubr.msk.f32.mxu1 %vm96_vm1, %v70_v28  ;;  %4859 = vmatpush3.bf16.msra.mxu1 %v5679_v26 }
  0x36   :  { %4331 = vmatmul.mubr.msk.f32.gmra.mrb[6].mxu0 %vm96_vm1, %v69_v27  ;;  %4861 = vmatprep.subr.bf16.mxu1 %v5723_v41 }
  0x37   :  { %216 = vmatprep.mubr.f32.mxu0 %v5506_v0 }
  0x38   :  { %4566 = vmatmul.mubr.msk.f32.gmra.mrb[6].mxu1 %vm96_vm1, %v71_v29 }
  0x39   :  { %4568 = vmatprep.mubr.msk.f32.mxu1 %vm96_vm1, %v72_v30 }
  0x3a   :  { %4332 = vmatmul.mubr.msk.f32.gmra.mrb[8].mxu0 %vm96_vm1, %v70_v28 }
  0x3b   :  { %222 = vmatprep.mubr.f32.mxu0 %v5506_v0 }
  0x3c   :  { %4569 = vmatmul.mubr.msk.f32.gmra.mrb[8].mxu1 %vm96_vm1, %v73_v15 }
  0x3d   :  { %4579 = vmatprep.mubr.msk.f32.mxu1 %vm5508_vm2, %v5506_v0 }
  0x3e   :  { %4333 = vmatmul.mubr.msk.f32.gmra.mrb[10].mxu0 %vm96_vm1, %v71_v29  ;;  %v5795_v29 = vadd.f32 %v5791_v24, %v5788_v23 }
  0x3f   :  { %228 = vmatprep.mubr.f32.mxu0 %v5506_v0 }
  0x40   :  { %4580 = vmatmul.mubr.f32.vlgmr.msra.gmra.mrb[10].mxu1 %v5506_v0 }
  0x41   :  { %692 = vmatprep.mubr.f32.mxu1 %v5506_v0  ;;  %4863 = vmatpush1.bf16.msra.mxu1 %v5725_v42 }
  0x42   :  { %4334 = vmatmul.mubr.msk.f32.gmra.mrb[12].mxu0 %vm96_vm1, %v72_v30  ;;  %4865 = vmatprep.subr.bf16.mxu1 %v5728_v46 }
  0x43   :  { %528 = vmatprep.mubr.f32.mxu0 %v5506_v0 }
  0x45   :  { %4867 = vmatpush1.bf16.msra.mxu1 %v5732_v48 }
  0x46   :  { %529 = vmatmul.mubr.f32.vlgmr.msra.gmra.mrb[0].mxu0 %v5506_v0  ;;  %4868 = vmatprep.subr.bf16.mxu1 %v5507_v25 }
  0x47   :  { %4601 = vmatprep.mubr.msk.f32.mxu0 %vm5508_vm2, %v5506_v0  ;;  %4884 = vmatpush3.bf16.msra.mxu0 %v5718_v33 }
  0x48   :  { %4885 = vmatprep.subr.bf16.mxu0 %v5507_v25 }
  0x4b   :  { %4887 = vmatpush3.bf16.msra.mxu0 %v5721_v40 }
  0x4c   :  { %4889 = vmatprep.subr.bf16.mxu0 %v5613_v8 }
  0x4e   :  { %4602 = vmatmul.mubr.f32.vlgmr.msra.gmra.mrb[14].mxu0 %v5506_v0 }
  0x4f   :  { %4891 = vmatpush1.bf16.msra.mxu0 %v5615_v9  ;;  %997 = vmatprep.mubr.f32.mxu0 %v5506_v0 }
  0x50   :  { %4893 = vmatprep.subr.bf16.mxu0 %v5629_v13 }
  0x53   :  { %4895 = vmatpush1.bf16.msra.mxu0 %v5648_v18 }
  0x54   :  { %4903 = vmatprep.subr.bf16.mxu0 %v5723_v41 }
  0xff   :  { %v5750_v53 = vpop.f32.mrb[0].mxu1 }
 0x100   :  { %v5753_v55 = vpop.f32.mrb[1].mxu1 }
 0x103   :  { %v4561_v56 = vpop.f32.mrb[2].mxu1 }
 0x104   :  { %v5755_v57 = vadd.f32 %v4561_v56, %v89_v54  ;;  %v307_v58 = vpop.f32.mrb[3].mxu1 }
 0x105   :  { %v308_v39 = vadd.f32 %v307_v58, %v89_v54 }
 0x107   :  { %v4564_v59 = vpop.f32.mrb[4].mxu1 }
 0x108   :  { %v5757_v60 = vadd.f32 %v4564_v59, %v89_v54  ;;  %v317_v61 = vpop.f32.mrb[5].mxu1 }
 0x109   :  { %v5759_v62 = vadd.f32 %v317_v61, %v89_v54  ;;  %v5802_v61 = vpack.c.bf16 %v433_v52, %v430_v50 }
 0x10b   :  { %v4567_v63 = vpop.f32.mrb[6].mxu1 }
 0x10c   :  { %v5761_v1 = vadd.f32 %v4567_v63, %v89_v54  ;;  %v327_v2 = vpop.f32.mrb[7].mxu1 }
 0x10d   :  { %v5763_v3 = vadd.f32 %v327_v2, %v89_v54  ;;  %v436_v2 = vld [vmem:[#allocation3 + $0x40] sm:$0xff] }
 0x10e   :  { %v5811_v58 = vpack.c.bf16 %v439_v5, %v436_v2 }
 0x10f   :  { %v4570_v6 = vpop.f32.mrb[8].mxu1 }
 0x110   :  { %v5770_v7 = vadd.f32 %v4570_v6, %v89_v54  ;;  %v337_v10 = vpop.f32.mrb[9].mxu1  ;;  %v383_v6 = vld [vmem:[#allocation5 + $0x8] sm:$0xff] }
 0x111   :  { %v5772_v11 = vadd.f32 %v337_v10, %v89_v54  ;;  %v386_v54 = vld [vmem:[#allocation5 + $0x20] sm:$0xff] }
 0x112   :  { %v5816_v10 = vpack.c.bf16 %v386_v54, %v383_v6 }
 0x113   :  { %v601_v15 = vpop.f32.mrb[10].mxu1 }
 0x114   :  { %v4581_v16 = vpop.f32.mrb[11].mxu1  ;;  %v602_v36 = vadd.f32 %v601_v15, %v5799_v35  ;;  %v382_v15 = vld [vmem:[#allocation5] sm:$0xff] }
 0x115   :  { %v385_v16 = vld [vmem:[#allocation5 + $0x18] sm:$0xff] }
 0x119   :  { %v530_v20 = vpop.f32.mrb[0].mxu0 }
 0x11a   :  { %v5191_v22 = vadd.f32 %v5782_v17, %v530_v20  ;;  %v532_v27 = vpop.f32.mrb[1].mxu0  ;;  %v389_v20 = vld [vmem:[#allocation5 + $0x38] sm:$0xff] }
 0x11b   :  { %v5193_v30 = vadd.f32 %v5795_v29, %v532_v27  ;;  %v5822_v27 = vpack.c.bf16 %v385_v16, %v382_v15 }
 0x11c   :  { %v4345_v28 = vmul.f32 -1.442695, %v5191_v22  ;;  %v392_v22 = vld [vmem:[#allocation5 + $0x50] sm:$0xff] }
 0x11d   :  { %v4346_v31 = vmul.f32 -1.442695, %v5193_v30  ;;  %v388_v30 = vld [vmem:[#allocation5 + $0x30] sm:$0xff] }
 0x11e   :  { %5294 = vpow2.f32 %v4345_v28  ;;  %v5825_v28 = vpack.c.bf16 %v392_v22, %v389_v20 }
 0x11f   :  { %5296 = vpow2.f32 %v4346_v31  ;;  %v391_v31 = vld [vmem:[#allocation5 + $0x48] sm:$0xff] }
 0x128   :  { %v5295_v32 = vpop.eup %5294 }
 0x129   :  { %v609_v34 = vadd.f32 1.0, %v5295_v32  ;;  %v5297_v37 = vpop.eup %5296  ;;  %v5832_v32 = vpack.c.bf16 %v391_v31, %v388_v30 }
 0x12a   :  { %v616_v44 = vadd.f32 1.0, %v5297_v37 }
 0x12b   :  { %5298 = vrcp.f32 %v609_v34  ;;  %v906_v34 = vpop.f32.mrb[14].mxu0 }
 0x135   :  { %v5299_v38 = vpop.eup %5298 }
 0x136   :  { %v619_v43 = vmul.f32 %v5299_v38, %v602_v36  ;;  %v4603_v36 = vpop.f32.mrb[15].mxu0 }
 0x138   :  { %v620_v45 = vadd.f32 %v619_v43, %v308_v39 }
 0x13a   :  { %5300 = vtanh.f32 %v620_v45  ;;  %v440_v45 = vld [vmem:[%s6287_s7] sm:$0x7] }
 0x13b   :  { %5302 = vrcp.f32 %v616_v44  ;;  %v411_v44 = vld [vmem:[%s6288_s8] sm:$0x7]  ;;  %v449_v16 = vrot.slane %v440_v45, %v5784_v19 }
 0x13c   :  { %v416_v52 = vrot.slane %v411_v44, %v5765_v4  ;;  %v420_v15 = vrot.slane %v411_v44, %v5784_v19 }
 0x13e   :  { %v5868_v31 = vadd.f32 %v449_v16, %v420_v15 }
 0x144   :  { %v5301_v47 = vpop.eup %5300 }
 0x145   :  { %v622_v49 = vsub.f32 0.0, %v5301_v47  ;;  %v5303_v56 = vpop.eup %5302 }
 0x147   :  { %v623_v59 = vmul.f32 %v5303_v56, %v622_v49  ;;  %v445_v56 = vrot.slane %v440_v45, %v5765_v4 }
 0x149   :  { %v5804_v63 = vadd.f32 %v5301_v47, %v623_v59  ;;  %v5863_v2 = vadd.f32 %v445_v56, %v416_v52 }
 0x14b   :  { %4347 = vmatmul.mubr.msk.f32.vlgmr.msra.gmra.mrb[12].mxu1 %vm460_vm3, %v5804_v63  ;;  %4351 = vmatmul.mubr.msk.f32.vlgmr.msra.gmra.mrb[2].mxu0 %vm460_vm3, %v5804_v63 }
 0x14c   :  { %4870 = vmatpush3.bf16.msra.mxu1 %v5802_v61  ;;  %4590 = vmatprep.mubr.msk.f32.mxu1 %vm5508_vm2, %v5506_v0 }
 0x14d   :  { %4871 = vmatprep.subr.bf16.mxu1 %v5507_v25  ;;  %4905 = vmatpush1.bf16.msra.mxu0 %v5725_v42 }
 0x14e   :  { %4907 = vmatprep.subr.bf16.mxu0 %v5728_v46  ;;  %1161 = vmatprep.mubr.f32.mxu0 %v5506_v0 }
 0x150   :  { %4873 = vmatpush3.bf16.msra.mxu1 %v5811_v58 }
 0x151   :  { %4875 = vmatprep.subr.bf16.mxu1 %v5816_v10  ;;  %4909 = vmatpush1.bf16.msra.mxu0 %v5732_v48 }
 0x152   :  { %4917 = vmatprep.subr.bf16.mxu0 %v5816_v10 }
 0x153   :  { %4591 = vmatmul.mubr.msk.f32.vlgmr.msra.gmra.mrb[14].mxu1 %vm460_vm3, %v5804_v63 }
 0x154   :  { %4877 = vmatpush1.bf16.msra.mxu1 %v5822_v27  ;;  %833 = vmatprep.mubr.f32.mxu1 %v5506_v0 }
 0x155   :  { %4879 = vmatprep.subr.bf16.mxu1 %v5825_v28 }
 0x158   :  { %4881 = vmatpush1.bf16.msra.mxu1 %v5832_v32 }
 0x159   :  { %4896 = vmatprep.subr.bf16.mxu1 %v5507_v25 }
 0x15b   :  { %834 = vmatmul.mubr.f32.vlgmr.msra.gmra.mrb[12].mxu1 %v5506_v0 }
 0x15c   :  { %4898 = vmatpush3.bf16.msra.mxu1 %v5660_v21  ;;  %4612 = vmatprep.mubr.msk.f32.mxu1 %vm5508_vm2, %v5506_v0 }
 0x15d   :  { %4899 = vmatprep.subr.bf16.mxu1 %v5507_v25 }
 0x160   :  { %4901 = vmatpush3.bf16.msra.mxu1 %v5679_v26 }
 0x161   :  { %4910 = vmatprep.subr.bf16.mxu1 %v5507_v25 }
 0x163   :  { %4613 = vmatmul.mubr.msk.f32.vlgmr.msra.gmra.mrb[16].mxu1 %vm460_vm3, %v5804_v63 }
 0x164   :  { %4912 = vmatpush3.bf16.msra.mxu1 %v5802_v61  ;;  %4623 = vmatprep.mubr.msk.f32.mxu1 %vm5508_vm2, %v5506_v0 }
 0x165   :  { %4913 = vmatprep.subr.bf16.mxu1 %v5507_v25 }
 0x168   :  { %4915 = vmatpush3.bf16.msra.mxu1 %v5811_v58 }
 0x169   :  { %4924 = vmatprep.subr.bf16.mxu1 %v5507_v25 }
 0x21e   :  { %v999_v37 = vpop.f32.mrb[2].mxu0 }
 0x21f   :  { %v5195_v38 = vadd.f32 %v5782_v17, %v999_v37  ;;  %v1001_v39 = vpop.f32.mrb[3].mxu0 }
 0x220   :  { %v5197_v49 = vadd.f32 %v5795_v29, %v1001_v39 }
 0x221   :  { %v4353_v43 = vmul.f32 -1.442695, %v5195_v38 }
 0x222   :  { %v4354_v59 = vmul.f32 -1.442695, %v5197_v49 }
 0x223   :  { %5304 = vpow2.f32 %v4353_v43 }
 0x224   :  { %5306 = vpow2.f32 %v4354_v59 }
 0x226   :  { %v765_v47 = vpop.f32.mrb[14].mxu1 }
 0x227   :  { %v4592_v50 = vpop.f32.mrb[15].mxu1 }
 0x22d   :  { %v5305_v5 = vpop.eup %5304 }
 0x22e   :  { %v1078_v6 = vadd.f32 1.0, %v5305_v5  ;;  %v835_v54 = vpop.f32.mrb[12].mxu1  ;;  %v5307_v38 = vpop.eup %5306  ;;  %v5874_v5 = vrot.slane %v411_v44, %v5745_v51 }
 0x22f   :  { %v5225_v20 = vadd.f32 %v5863_v2, %v835_v54  ;;  %v837_v22 = vpop.f32.mrb[13].mxu1  ;;  %v1085_v52 = vadd.f32 1.0, %v5307_v38 }
 0x230   :  { %5308 = vrcp.f32 %v1078_v6  ;;  %v5227_v4 = vadd.f32 %v5868_v31, %v837_v22  ;;  %v5877_v6 = vrot.slane %v440_v45, %v5745_v51  ;;  %v907_v16 = vadd.f32 %v906_v34, %v5874_v5 }
 0x231   :  { %v4349_v30 = vmul.f32 -1.442695, %v5225_v20 }
 0x232   :  { %v4350_v49 = vmul.f32 -1.442695, %v5227_v4 }
 0x233   :  { %5310 = vpow2.f32 %v4349_v30 }
 0x234   :  { %5312 = vpow2.f32 %v4350_v49 }
 0x236   :  { %v1070_v36 = vpop.f32.mrb[16].mxu1 }
 0x237   :  { %v4614_v37 = vpop.f32.mrb[17].mxu1  ;;  %v1071_v39 = vadd.f32 %v1070_v36, %v5799_v35 }
 0x23a   :  { %v5309_v43 = vpop.eup %5308 }
 0x23b   :  { %v1088_v50 = vmul.f32 %v5309_v43, %v1071_v39 }
 0x23d   :  { %v5311_v19 = vpop.eup %5310  ;;  %v1089_v56 = vadd.f32 %v1088_v50, %v5755_v57  ;;  %v766_v57 = vadd.f32 %v765_v47, %v5877_v6 }
 0x23e   :  { %v914_v59 = vadd.f32 1.0, %v5311_v19  ;;  %v5313_v54 = vpop.eup %5312 }
 0x23f   :  { %5314 = vtanh.f32 %v1089_v56  ;;  %v921_v38 = vadd.f32 1.0, %v5313_v54 }
 0x240   :  { %5316 = vrcp.f32 %v914_v59 }
 0x241   :  { %5318 = vrcp.f32 %v1085_v52 }
 0x249   :  { %v5315_v15 = vpop.eup %5314 }
 0x24a   :  { %v5317_v20 = vpop.eup %5316  ;;  %v1091_v22 = vsub.f32 %v5804_v63, %v5315_v15 }
 0x24b   :  { %v5319_v30 = vpop.eup %5318  ;;  %v924_v4 = vmul.f32 %v5317_v20, %v907_v16 }
 0x24c   :  { %v1092_v36 = vmul.f32 %v5319_v30, %v1091_v22 }
 0x24d   :  { %v925_v37 = vadd.f32 %v924_v4, %v766_v57 }
 0x24e   :  { %v5882_v39 = vadd.f32 %v5315_v15, %v1092_v36 }
 0x24f   :  { %5320 = vtanh.f32 %v925_v37 }
 0x250   :  { %4355 = vmatmul.mubr.msk.f32.vlgmr.msra.gmra.mrb[16].mxu0 %vm460_vm3, %v5882_v39  ;;  %4624 = vmatmul.mubr.msk.f32.vlgmr.msra.gmra.mrb[18].mxu1 %vm460_vm3, %v5882_v39  ;;  %5322 = vrcp.f32 %v921_v38 }
 0x251   :  { %4919 = vmatpush1.bf16.msra.mxu0 %v5822_v27  ;;  %4926 = vmatpush3.bf16.msra.mxu1 %v5718_v33 }
 0x252   :  { %4921 = vmatprep.subr.bf16.mxu0 %v5825_v28  ;;  %4927 = vmatprep.subr.bf16.mxu1 %v5507_v25 }
 0x253   :  { %1305 = vmatprep.mubr.f32.mxu0 %v5506_v0  ;;  %4634 = vmatprep.mubr.msk.f32.mxu1 %vm5508_vm2, %v5506_v0 }
 0x255   :  { %4923 = vmatpush1.bf16.msra.mxu0 %v5832_v32  ;;  %4929 = vmatpush3.bf16.msra.mxu1 %v5721_v40 }
 0x256   :  { %4931 = vmatprep.subr.bf16.mxu0 %v5613_v8  ;;  %4938 = vmatprep.subr.bf16.mxu1 %v5507_v25 }
 0x259   :  { %v5321_v51 = vpop.eup %5320 }
 0x25a   :  { %v927_v63 = vsub.f32 0.0, %v5321_v51  ;;  %v5323_v34 = vpop.eup %5322 }
 0x25c   :  { %v928_v44 = vmul.f32 %v5323_v34, %v927_v63 }
 0x25e   :  { %v5899_v45 = vadd.f32 %v5321_v51, %v928_v44 }
 0x260   :  { %4357 = vmatmul.mubr.msk.f32.vlgmr.msra.gmra.mrb[16].mxu0 %vm460_vm3, %v5899_v45  ;;  %4635 = vmatmul.mubr.msk.f32.vlgmr.msra.gmra.mrb[20].mxu1 %vm460_vm3, %v5899_v45 }
 0x261   :  { %4933 = vmatpush1.bf16.msra.mxu0 %v5615_v9  ;;  %4940 = vmatpush3.bf16.msra.mxu1 %v5660_v21 }
 0x262   :  { %4935 = vmatprep.subr.bf16.mxu0 %v5629_v13  ;;  %4941 = vmatprep.subr.bf16.mxu1 %v5507_v25 }
 0x263   :  { %1469 = vmatprep.mubr.f32.mxu0 %v5506_v0  ;;  %4645 = vmatprep.mubr.msk.f32.mxu1 %vm5508_vm2, %v5506_v0 }
 0x265   :  { %4937 = vmatpush1.bf16.msra.mxu0 %v5648_v18  ;;  %4943 = vmatpush3.bf16.msra.mxu1 %v5679_v26 }
 0x266   :  { %4945 = vmatprep.subr.bf16.mxu0 %v5723_v41  ;;  %4952 = vmatprep.subr.bf16.mxu1 %v5507_v25 }
 0x268   :  { %4361 = vmatmul.mubr.msk.f32.vlgmr.msra.gmra.mrb[4].mxu0 %vm460_vm3, %v5882_v39  ;;  %4646 = vmatmul.mubr.msk.f32.vlgmr.msra.gmra.mrb[22].mxu1 %vm460_vm3, %v5882_v39 }
 0x269   :  { %4947 = vmatpush1.bf16.msra.mxu0 %v5725_v42  ;;  %4954 = vmatpush3.bf16.msra.mxu1 %v5802_v61 }
 0x26a   :  { %4949 = vmatprep.subr.bf16.mxu0 %v5728_v46  ;;  %4955 = vmatprep.subr.bf16.mxu1 %v5507_v25 }
 0x26b   :  { %1633 = vmatprep.mubr.f32.mxu0 %v5506_v0  ;;  %4656 = vmatprep.mubr.msk.f32.mxu1 %vm5508_vm2, %v5506_v0 }
 0x26d   :  { %4951 = vmatpush1.bf16.msra.mxu0 %v5732_v48  ;;  %4957 = vmatpush3.bf16.msra.mxu1 %v5811_v58 }
 0x26e   :  { %4959 = vmatprep.subr.bf16.mxu0 %v5816_v10  ;;  %4966 = vmatprep.subr.bf16.mxu1 %v5507_v25 }
 0x323   :  { %v1234_v47 = vpop.f32.mrb[18].mxu1 }
 0x324   :  { %v4625_v43 = vpop.f32.mrb[19].mxu1 }
 0x333   :  { %v1307_v49 = vpop.f32.mrb[16].mxu0  ;;  %v1378_v50 = vpop.f32.mrb[20].mxu1 }
 0x334   :  { %v5229_v19 = vadd.f32 %v5863_v2, %v1307_v49  ;;  %v1309_v52 = vpop.f32.mrb[17].mxu0  ;;  %v4636_v56 = vpop.f32.mrb[21].mxu1  ;;  %v1379_v43 = vadd.f32 %v1378_v50, %v5874_v5 }
 0x335   :  { %v5231_v16 = vadd.f32 %v5868_v31, %v1309_v52 }
 0x336   :  { %v4359_v59 = vmul.f32 -1.442695, %v5229_v19  ;;  %v1235_v19 = vadd.f32 %v1234_v47, %v5877_v6 }
 0x337   :  { %v4360_v4 = vmul.f32 -1.442695, %v5231_v16 }
 0x338   :  { %5324 = vpow2.f32 %v4359_v59 }
 0x33b   :  { %v1471_v54 = vpop.f32.mrb[4].mxu0  ;;  %v1542_v15 = vpop.f32.mrb[22].mxu1 }
 0x33c   :  { %v5199_v20 = vadd.f32 %v5782_v17, %v1471_v54  ;;  %v1473_v22 = vpop.f32.mrb[5].mxu0  ;;  %v4647_v30 = vpop.f32.mrb[23].mxu1  ;;  %v1543_v16 = vadd.f32 %v1542_v15, %v5799_v35 }
 0x33d   :  { %v5201_v38 = vadd.f32 %v5795_v29, %v1473_v22 }
 0x33e   :  { %v4363_v57 = vmul.f32 -1.442695, %v5199_v20 }
 0x33f   :  { %v4364_v51 = vmul.f32 -1.442695, %v5201_v38 }
 0x340   :  { %5326 = vpow2.f32 %v4363_v57 }
 0x341   :  { %5328 = vpow2.f32 %v4360_v4 }
 0x342   :  { %v5325_v36 = vpop.eup %5324 }
 0x343   :  { %v1386_v37 = vadd.f32 1.0, %v5325_v36 }
 0x345   :  { %5330 = vrcp.f32 %v1386_v37 }
 0x346   :  { %5332 = vpow2.f32 %v4364_v51 }
 0x34a   :  { %v5327_v63 = vpop.eup %5326 }
 0x34b   :  { %v1550_v34 = vadd.f32 1.0, %v5327_v63  ;;  %v5329_v44 = vpop.eup %5328 }
 0x34c   :  { %v1393_v59 = vadd.f32 1.0, %v5329_v44 }
 0x34d   :  { %5334 = vrcp.f32 %v1550_v34 }
 0x34f   :  { %v5331_v49 = vpop.eup %5330 }
 0x350   :  { %v1396_v52 = vmul.f32 %v5331_v49, %v1379_v43  ;;  %v5333_v54 = vpop.eup %5332 }
 0x351   :  { %v1557_v57 = vadd.f32 1.0, %v5333_v54 }
 0x352   :  { %v1397_v56 = vadd.f32 %v1396_v52, %v1235_v19 }
 0x354   :  { %5336 = vtanh.f32 %v1397_v56 }
 0x355   :  { %5338 = vrcp.f32 %v1393_v59 }
 0x357   :  { %v5335_v20 = vpop.eup %5334 }
 0x358   :  { %v1560_v22 = vmul.f32 %v5335_v20, %v1543_v16 }
 0x35a   :  { %v1561_v30 = vadd.f32 %v1560_v22, %v5759_v62 }
 0x35c   :  { %5340 = vtanh.f32 %v1561_v30 }
 0x35d   :  { %5342 = vrcp.f32 %v1557_v57 }
 0x35e   :  { %v5337_v4 = vpop.eup %5336 }
 0x35f   :  { %v1399_v50 = vsub.f32 %v5899_v45, %v5337_v4  ;;  %v5339_v36 = vpop.eup %5338 }
 0x361   :  { %v1400_v47 = vmul.f32 %v5339_v36, %v1399_v50 }
 0x363   :  { %v5940_v37 = vadd.f32 %v5337_v4, %v1400_v47 }
 0x366   :  { %v5341_v38 = vpop.eup %5340 }
 0x367   :  { %v1563_v51 = vsub.f32 %v5882_v39, %v5341_v38  ;;  %v5343_v63 = vpop.eup %5342 }
 0x369   :  { %v1564_v34 = vmul.f32 %v5343_v63, %v1563_v51 }
 0x36b   :  { %v5943_v15 = vadd.f32 %v5341_v38, %v1564_v34 }
 0x36d   :  { %4365 = vmatmul.mubr.msk.f32.vlgmr.msra.gmra.mrb[18].mxu0 %vm460_vm3, %v5943_v15  ;;  %4657 = vmatmul.mubr.msk.f32.vlgmr.msra.gmra.mrb[24].mxu1 %vm460_vm3, %v5943_v15 }
 0x36e   :  { %4961 = vmatpush1.bf16.msra.mxu0 %v5822_v27  ;;  %4968 = vmatpush3.bf16.msra.mxu1 %v5718_v33 }
 0x36f   :  { %4963 = vmatprep.subr.bf16.mxu0 %v5825_v28  ;;  %4969 = vmatprep.subr.bf16.mxu1 %v5507_v25 }
 0x370   :  { %4667 = vmatprep.mubr.msk.f32.mxu1 %vm5508_vm2, %v5506_v0  ;;  %1777 = vmatprep.mubr.f32.mxu0 %v5506_v0 }
 0x372   :  { %4965 = vmatpush1.bf16.msra.mxu0 %v5832_v32  ;;  %4971 = vmatpush3.bf16.msra.mxu1 %v5721_v40 }
 0x373   :  { %4973 = vmatprep.subr.bf16.mxu0 %v5613_v8  ;;  %4980 = vmatprep.subr.bf16.mxu1 %v5507_v25 }
 0x375   :  { %4668 = vmatmul.mubr.msk.f32.vlgmr.msra.gmra.mrb[26].mxu1 %vm460_vm3, %v5940_v37  ;;  %4367 = vmatmul.mubr.msk.f32.vlgmr.msra.gmra.mrb[18].mxu0 %vm460_vm3, %v5940_v37 }
 0x376   :  { %4975 = vmatpush1.bf16.msra.mxu0 %v5615_v9  ;;  %4982 = vmatpush3.bf16.msra.mxu1 %v5660_v21 }
 0x377   :  { %4977 = vmatprep.subr.bf16.mxu0 %v5629_v13  ;;  %4983 = vmatprep.subr.bf16.mxu1 %v5507_v25 }
 0x378   :  { %1941 = vmatprep.mubr.f32.mxu0 %v5506_v0  ;;  %4678 = vmatprep.mubr.msk.f32.mxu1 %vm5508_vm2, %v5506_v0 }
 0x37a   :  { %4979 = vmatpush1.bf16.msra.mxu0 %v5648_v18  ;;  %4985 = vmatpush3.bf16.msra.mxu1 %v5679_v26 }
 0x37b   :  { %4987 = vmatprep.subr.bf16.mxu0 %v5723_v41  ;;  %4994 = vmatprep.subr.bf16.mxu1 %v5507_v25 }
 0x37d   :  { %4371 = vmatmul.mubr.msk.f32.vlgmr.msra.gmra.mrb[6].mxu0 %vm460_vm3, %v5943_v15  ;;  %4679 = vmatmul.mubr.msk.f32.vlgmr.msra.gmra.mrb[28].mxu1 %vm460_vm3, %v5943_v15 }
 0x37e   :  { %4989 = vmatpush1.bf16.msra.mxu0 %v5725_v42  ;;  %4996 = vmatpush3.bf16.msra.mxu1 %v5802_v61 }
 0x37f   :  { %4991 = vmatprep.subr.bf16.mxu0 %v5728_v46  ;;  %4997 = vmatprep.subr.bf16.mxu1 %v5507_v25 }
 0x380   :  { %2105 = vmatprep.mubr.f32.mxu0 %v5506_v0  ;;  %4689 = vmatprep.mubr.msk.f32.mxu1 %vm5508_vm2, %v5506_v0 }
 0x382   :  { %4993 = vmatpush1.bf16.msra.mxu0 %v5732_v48  ;;  %4999 = vmatpush3.bf16.msra.mxu1 %v5811_v58 }
 0x383   :  { %5001 = vmatprep.subr.bf16.mxu0 %v5816_v10  ;;  %5008 = vmatprep.subr.bf16.mxu1 %v5507_v25 }
 0x440   :  { %v1706_v62 = vpop.f32.mrb[24].mxu1 }
 0x441   :  { %v4658_v39 = vpop.f32.mrb[25].mxu1 }
 0x448   :  { %v1850_v45 = vpop.f32.mrb[26].mxu1  ;;  %v1779_v44 = vpop.f32.mrb[18].mxu0 }
 0x449   :  { %v5233_v43 = vadd.f32 %v5863_v2, %v1779_v44  ;;  %v4669_v49 = vpop.f32.mrb[27].mxu1  ;;  %v1781_v19 = vpop.f32.mrb[19].mxu0  ;;  %v1851_v34 = vadd.f32 %v1850_v45, %v5874_v5  ;;  %v1707_v44 = vadd.f32 %v1706_v62, %v5877_v6 }
 0x44a   :  { %v5235_v54 = vadd.f32 %v5868_v31, %v1781_v19 }
 0x44b   :  { %v4369_v52 = vmul.f32 -1.442695, %v5233_v43 }
 0x44c   :  { %v4370_v57 = vmul.f32 -1.442695, %v5235_v54 }
 0x44d   :  { %5344 = vpow2.f32 %v4369_v52 }
 0x450   :  { %v1943_v56 = vpop.f32.mrb[6].mxu0  ;;  %v2014_v59 = vpop.f32.mrb[28].mxu1 }
 0x451   :  { %v5203_v16 = vadd.f32 %v5782_v17, %v1943_v56  ;;  %v1945_v20 = vpop.f32.mrb[7].mxu0  ;;  %v4680_v22 = vpop.f32.mrb[29].mxu1  ;;  %v2015_v56 = vadd.f32 %v2014_v59, %v5799_v35 }
 0x452   :  { %v5205_v36 = vadd.f32 %v5795_v29, %v1945_v20 }
 0x453   :  { %v4373_v30 = vmul.f32 -1.442695, %v5203_v16 }
 0x454   :  { %v4374_v47 = vmul.f32 -1.442695, %v5205_v36 }
 0x455   :  { %5346 = vpow2.f32 %v4373_v30 }
 0x456   :  { %5348 = vpow2.f32 %v4370_v57 }
 0x457   :  { %v5345_v4 = vpop.eup %5344 }
 0x458   :  { %v1858_v50 = vadd.f32 1.0, %v5345_v4 }
 0x45a   :  { %5350 = vrcp.f32 %v1858_v50 }
 0x45b   :  { %5352 = vpow2.f32 %v4374_v47 }
 0x45f   :  { %v5347_v38 = vpop.eup %5346 }
 0x460   :  { %v2022_v51 = vadd.f32 1.0, %v5347_v38  ;;  %v5349_v63 = vpop.eup %5348 }
 0x461   :  { %v1865_v19 = vadd.f32 1.0, %v5349_v63 }
 0x462   :  { %5354 = vrcp.f32 %v2022_v51 }
 0x464   :  { %v5351_v39 = vpop.eup %5350 }
 0x465   :  { %v1868_v43 = vmul.f32 %v5351_v39, %v1851_v34  ;;  %v5353_v52 = vpop.eup %5352 }
 0x466   :  { %v2029_v22 = vadd.f32 1.0, %v5353_v52 }
 0x467   :  { %v1869_v49 = vadd.f32 %v1868_v43, %v1707_v44 }
 0x469   :  { %5356 = vtanh.f32 %v1869_v49 }
 0x46a   :  { %5358 = vrcp.f32 %v1865_v19 }
 0x46c   :  { %v5355_v54 = vpop.eup %5354 }
 0x46d   :  { %v2032_v16 = vmul.f32 %v5355_v54, %v2015_v56 }
 0x46f   :  { %v2033_v20 = vadd.f32 %v2032_v16, %v5757_v60 }
 0x471   :  { %5360 = vtanh.f32 %v2033_v20 }
 0x472   :  { %5362 = vrcp.f32 %v2029_v22 }
 0x473   :  { %v5357_v30 = vpop.eup %5356 }
 0x474   :  { %v1871_v45 = vsub.f32 %v5940_v37, %v5357_v30  ;;  %v5359_v57 = vpop.eup %5358 }
 0x476   :  { %v1872_v62 = vmul.f32 %v5359_v57, %v1871_v45 }
 0x478   :  { %v5999_v4 = vadd.f32 %v5357_v30, %v1872_v62 }
 0x47b   :  { %v5361_v50 = vpop.eup %5360 }
 0x47c   :  { %v2035_v36 = vsub.f32 %v5943_v15, %v5361_v50  ;;  %v5363_v47 = vpop.eup %5362 }
 0x47e   :  { %v2036_v38 = vmul.f32 %v5363_v47, %v2035_v36 }
 0x480   :  { %v6002_v59 = vadd.f32 %v5361_v50, %v2036_v38 }
 0x482   :  { %4375 = vmatmul.mubr.msk.f32.vlgmr.msra.gmra.mrb[20].mxu0 %vm460_vm3, %v6002_v59  ;;  %4690 = vmatmul.mubr.msk.f32.vlgmr.msra.gmra.mrb[30].mxu1 %vm460_vm3, %v6002_v59 }
 0x483   :  { %5003 = vmatpush1.bf16.msra.mxu0 %v5822_v27  ;;  %5010 = vmatpush3.bf16.msra.mxu1 %v5718_v33 }
 0x484   :  { %5005 = vmatprep.subr.bf16.mxu0 %v5825_v28  ;;  %5011 = vmatprep.subr.bf16.mxu1 %v5507_v25 }
 0x485   :  { %4700 = vmatprep.mubr.msk.f32.mxu1 %vm5508_vm2, %v5506_v0  ;;  %2249 = vmatprep.mubr.f32.mxu0 %v5506_v0 }
 0x487   :  { %5007 = vmatpush1.bf16.msra.mxu0 %v5832_v32  ;;  %5013 = vmatpush3.bf16.msra.mxu1 %v5721_v40 }
 0x488   :  { %5015 = vmatprep.subr.bf16.mxu0 %v5613_v8  ;;  %5022 = vmatprep.subr.bf16.mxu1 %v5507_v25 }
 0x48a   :  { %4701 = vmatmul.mubr.msk.f32.vlgmr.msra.gmra.mrb[32].mxu1 %vm460_vm3, %v5999_v4  ;;  %4377 = vmatmul.mubr.msk.f32.vlgmr.msra.gmra.mrb[20].mxu0 %vm460_vm3, %v5999_v4 }
 0x48b   :  { %5017 = vmatpush1.bf16.msra.mxu0 %v5615_v9  ;;  %5024 = vmatpush3.bf16.msra.mxu1 %v5660_v21 }
 0x48c   :  { %5019 = vmatprep.subr.bf16.mxu0 %v5629_v13  ;;  %5025 = vmatprep.subr.bf16.mxu1 %v5507_v25 }
 0x48d   :  { %2413 = vmatprep.mubr.f32.mxu0 %v5506_v0  ;;  %4711 = vmatprep.mubr.msk.f32.mxu1 %vm5508_vm2, %v5506_v0 }
 0x48f   :  { %5021 = vmatpush1.bf16.msra.mxu0 %v5648_v18  ;;  %5027 = vmatpush3.bf16.msra.mxu1 %v5679_v26 }
 0x490   :  { %5029 = vmatprep.subr.bf16.mxu0 %v5723_v41  ;;  %5036 = vmatprep.subr.bf16.mxu1 %v5507_v25 }
 0x492   :  { %4381 = vmatmul.mubr.msk.f32.vlgmr.msra.gmra.mrb[8].mxu0 %vm460_vm3, %v6002_v59  ;;  %4712 = vmatmul.mubr.msk.f32.vlgmr.msra.gmra.mrb[34].mxu1 %vm460_vm3, %v6002_v59 }
 0x493   :  { %5031 = vmatpush1.bf16.msra.mxu0 %v5725_v42  ;;  %5038 = vmatpush3.bf16.msra.mxu1 %v5802_v61 }
 0x494   :  { %5033 = vmatprep.subr.bf16.mxu0 %v5728_v46  ;;  %5039 = vmatprep.subr.bf16.mxu1 %v5507_v25 }
 0x495   :  { %2577 = vmatprep.mubr.f32.mxu0 %v5506_v0  ;;  %4722 = vmatprep.mubr.msk.f32.mxu1 %vm5508_vm2, %v5506_v0 }
 0x497   :  { %5035 = vmatpush1.bf16.msra.mxu0 %v5732_v48  ;;  %5041 = vmatpush3.bf16.msra.mxu1 %v5811_v58 }
 0x498   :  { %5043 = vmatprep.subr.bf16.mxu0 %v5816_v10  ;;  %5050 = vmatprep.subr.bf16.mxu1 %v5507_v25 }
 0x555   :  { %v2178_v60 = vpop.f32.mrb[30].mxu1 }
 0x556   :  { %v4691_v37 = vpop.f32.mrb[31].mxu1 }
 0x557   :  { %v2179_v37 = vadd.f32 %v2178_v60, %v5877_v6 }
 0x55d   :  { %v2322_v15 = vpop.f32.mrb[32].mxu1  ;;  %v2251_v51 = vpop.f32.mrb[20].mxu0 }
 0x55e   :  { %v5237_v63 = vadd.f32 %v5863_v2, %v2251_v51  ;;  %v4702_v34 = vpop.f32.mrb[33].mxu1  ;;  %v2253_v39 = vpop.f32.mrb[21].mxu0  ;;  %v2323_v47 = vadd.f32 %v2322_v15, %v5874_v5 }
 0x55f   :  { %v5239_v19 = vadd.f32 %v5868_v31, %v2253_v39 }
 0x560   :  { %v4379_v44 = vmul.f32 -1.442695, %v5237_v63 }
 0x561   :  { %v4380_v20 = vmul.f32 -1.442695, %v5239_v19 }
 0x562   :  { %5364 = vpow2.f32 %v4379_v44 }
 0x565   :  { %v2415_v43 = vpop.f32.mrb[8].mxu0  ;;  %v2486_v49 = vpop.f32.mrb[34].mxu1 }
 0x566   :  { %v5207_v52 = vadd.f32 %v5782_v17, %v2415_v43  ;;  %v2417_v56 = vpop.f32.mrb[9].mxu0  ;;  %v4713_v54 = vpop.f32.mrb[35].mxu1  ;;  %v2487_v44 = vadd.f32 %v2486_v49, %v5799_v35 }
 0x567   :  { %v5209_v45 = vadd.f32 %v5795_v29, %v2417_v56 }
 0x568   :  { %v4383_v16 = vmul.f32 -1.442695, %v5207_v52 }
 0x569   :  { %v4384_v57 = vmul.f32 -1.442695, %v5209_v45 }
 0x56a   :  { %5366 = vpow2.f32 %v4383_v16 }
 0x56b   :  { %5368 = vpow2.f32 %v4380_v20 }
 0x56c   :  { %v5365_v22 = vpop.eup %5364 }
 0x56d   :  { %v2330_v30 = vadd.f32 1.0, %v5365_v22 }
 0x56f   :  { %5370 = vrcp.f32 %v2330_v30 }
 0x570   :  { %5372 = vpow2.f32 %v4384_v57 }
 0x574   :  { %v5367_v62 = vpop.eup %5366 }
 0x575   :  { %v2494_v50 = vadd.f32 1.0, %v5367_v62  ;;  %v5369_v36 = vpop.eup %5368 }
 0x576   :  { %v2337_v34 = vadd.f32 1.0, %v5369_v36 }
 0x577   :  { %5374 = vrcp.f32 %v2494_v50 }
 0x579   :  { %v5371_v38 = vpop.eup %5370 }
 0x57a   :  { %v2340_v51 = vmul.f32 %v5371_v38, %v2323_v47  ;;  %v5373_v39 = vpop.eup %5372 }
 0x57b   :  { %v2501_v56 = vadd.f32 1.0, %v5373_v39 }
 0x57c   :  { %v2341_v63 = vadd.f32 %v2340_v51, %v2179_v37 }
 0x57e   :  { %5376 = vtanh.f32 %v2341_v63 }
 0x57f   :  { %5378 = vrcp.f32 %v2337_v34 }
 0x581   :  { %v5375_v43 = vpop.eup %5374 }
 0x582   :  { %v2504_v19 = vmul.f32 %v5375_v43, %v2487_v44 }
 0x584   :  { %v2505_v52 = vadd.f32 %v2504_v19, %v5763_v3 }
 0x586   :  { %5380 = vtanh.f32 %v2505_v52 }
 0x587   :  { %5382 = vrcp.f32 %v2501_v56 }
 0x588   :  { %v5377_v54 = vpop.eup %5376 }
 0x589   :  { %v2343_v15 = vsub.f32 %v5999_v4, %v5377_v54  ;;  %v5379_v16 = vpop.eup %5378 }
 0x58b   :  { %v2344_v60 = vmul.f32 %v5379_v16, %v2343_v15 }
 0x58d   :  { %v6058_v20 = vadd.f32 %v5377_v54, %v2344_v60 }
 0x590   :  { %v5381_v22 = vpop.eup %5380 }
 0x591   :  { %v2507_v30 = vsub.f32 %v6002_v59, %v5381_v22  ;;  %v5383_v45 = vpop.eup %5382 }
 0x593   :  { %v2508_v57 = vmul.f32 %v5383_v45, %v2507_v30 }
 0x595   :  { %v6061_v49 = vadd.f32 %v5381_v22, %v2508_v57 }
 0x597   :  { %4385 = vmatmul.mubr.msk.f32.vlgmr.msra.gmra.mrb[22].mxu0 %vm460_vm3, %v6061_v49  ;;  %4723 = vmatmul.mubr.msk.f32.vlgmr.msra.gmra.mrb[36].mxu1 %vm460_vm3, %v6061_v49 }
 0x598   :  { %5045 = vmatpush1.bf16.msra.mxu0 %v5822_v27  ;;  %5052 = vmatpush3.bf16.msra.mxu1 %v5718_v33 }
 0x599   :  { %5047 = vmatprep.subr.bf16.mxu0 %v5825_v28  ;;  %5053 = vmatprep.subr.bf16.mxu1 %v5507_v25 }
 0x59a   :  { %4733 = vmatprep.mubr.msk.f32.mxu1 %vm5508_vm2, %v5506_v0  ;;  %2721 = vmatprep.mubr.f32.mxu0 %v5506_v0 }
 0x59c   :  { %5049 = vmatpush1.bf16.msra.mxu0 %v5832_v32  ;;  %5055 = vmatpush3.bf16.msra.mxu1 %v5721_v40 }
 0x59d   :  { %5057 = vmatprep.subr.bf16.mxu0 %v5613_v8  ;;  %5064 = vmatprep.subr.bf16.mxu1 %v5507_v25 }
 0x59f   :  { %4734 = vmatmul.mubr.msk.f32.vlgmr.msra.gmra.mrb[38].mxu1 %vm460_vm3, %v6058_v20  ;;  %4387 = vmatmul.mubr.msk.f32.vlgmr.msra.gmra.mrb[22].mxu0 %vm460_vm3, %v6058_v20 }
 0x5a0   :  { %5059 = vmatpush1.bf16.msra.mxu0 %v5615_v9  ;;  %5066 = vmatpush3.bf16.msra.mxu1 %v5660_v21 }
 0x5a1   :  { %5061 = vmatprep.subr.bf16.mxu0 %v5629_v13  ;;  %5067 = vmatprep.subr.bf16.mxu1 %v5507_v25 }
 0x5a2   :  { %2885 = vmatprep.mubr.f32.mxu0 %v5506_v0  ;;  %4744 = vmatprep.mubr.msk.f32.mxu1 %vm5508_vm2, %v5506_v0 }
 0x5a4   :  { %5063 = vmatpush1.bf16.msra.mxu0 %v5648_v18  ;;  %5069 = vmatpush3.bf16.msra.mxu1 %v5679_v26 }
 0x5a5   :  { %5071 = vmatprep.subr.bf16.mxu0 %v5723_v41  ;;  %5078 = vmatprep.subr.bf16.mxu1 %v5507_v25 }
 0x5a7   :  { %4391 = vmatmul.mubr.msk.f32.vlgmr.msra.gmra.mrb[10].mxu0 %vm460_vm3, %v6061_v49  ;;  %4745 = vmatmul.mubr.msk.f32.vlgmr.msra.gmra.mrb[40].mxu1 %vm460_vm3, %v6061_v49 }
 0x5a8   :  { %5073 = vmatpush1.bf16.msra.mxu0 %v5725_v42  ;;  %5080 = vmatpush3.bf16.msra.mxu1 %v5802_v61 }
 0x5a9   :  { %5075 = vmatprep.subr.bf16.mxu0 %v5728_v46  ;;  %5081 = vmatprep.subr.bf16.mxu1 %v5507_v25 }
 0x5aa   :  { %3049 = vmatprep.mubr.f32.mxu0 %v5506_v0  ;;  %4755 = vmatprep.mubr.msk.f32.mxu1 %vm5508_vm2, %v5506_v0 }
 0x5ac   :  { %5077 = vmatpush1.bf16.msra.mxu0 %v5732_v48  ;;  %5083 = vmatpush3.bf16.msra.mxu1 %v5811_v58 }
 0x5ad   :  { %5085 = vmatprep.subr.bf16.mxu0 %v5816_v10  ;;  %5092 = vmatprep.subr.bf16.mxu1 %v5507_v25 }
 0x66a   :  { %v2650_v3 = vpop.f32.mrb[36].mxu1 }
 0x66b   :  { %v4724_v4 = vpop.f32.mrb[37].mxu1  ;;  %v2651_v57 = vadd.f32 %v2650_v3, %v5877_v6 }
 0x672   :  { %v2794_v59 = vpop.f32.mrb[38].mxu1  ;;  %v2723_v62 = vpop.f32.mrb[22].mxu0 }
 0x673   :  { %v5241_v50 = vadd.f32 %v5863_v2, %v2723_v62  ;;  %v4735_v36 = vpop.f32.mrb[39].mxu1  ;;  %v2725_v47 = vpop.f32.mrb[23].mxu0  ;;  %v2795_v30 = vadd.f32 %v2794_v59, %v5874_v5 }
 0x674   :  { %v5243_v63 = vadd.f32 %v5868_v31, %v2725_v47 }
 0x675   :  { %v4389_v38 = vmul.f32 -1.442695, %v5241_v50 }
 0x676   :  { %v4390_v19 = vmul.f32 -1.442695, %v5243_v63 }
 0x677   :  { %5384 = vpow2.f32 %v4389_v38 }
 0x67a   :  { %v2887_v37 = vpop.f32.mrb[10].mxu0  ;;  %v2958_v51 = vpop.f32.mrb[40].mxu1 }
 0x67b   :  { %v5211_v34 = vadd.f32 %v5782_v17, %v2887_v37  ;;  %v2889_v39 = vpop.f32.mrb[11].mxu0  ;;  %v4746_v44 = vpop.f32.mrb[41].mxu1  ;;  %v2959_v47 = vadd.f32 %v2958_v51, %v5799_v35 }
 0x67c   :  { %v5213_v54 = vadd.f32 %v5795_v29, %v2889_v39 }
 0x67d   :  { %v4393_v43 = vmul.f32 -1.442695, %v5211_v34 }
 0x67e   :  { %v4394_v15 = vmul.f32 -1.442695, %v5213_v54 }
 0x67f   :  { %5386 = vpow2.f32 %v4393_v43 }
 0x680   :  { %5388 = vpow2.f32 %v4390_v19 }
 0x681   :  { %v5385_v52 = vpop.eup %5384 }
 0x682   :  { %v2802_v56 = vadd.f32 1.0, %v5385_v52 }
 0x684   :  { %5390 = vrcp.f32 %v2802_v56 }
 0x685   :  { %5392 = vpow2.f32 %v4394_v15 }
 0x689   :  { %v5387_v16 = vpop.eup %5386 }
 0x68a   :  { %v2966_v60 = vadd.f32 1.0, %v5387_v16  ;;  %v5389_v22 = vpop.eup %5388 }
 0x68b   :  { %v2809_v50 = vadd.f32 1.0, %v5389_v22 }
 0x68c   :  { %5394 = vrcp.f32 %v2966_v60 }
 0x68e   :  { %v5391_v45 = vpop.eup %5390 }
 0x68f   :  { %v2812_v4 = vmul.f32 %v5391_v45, %v2795_v30  ;;  %v5393_v36 = vpop.eup %5392 }
 0x690   :  { %v2973_v34 = vadd.f32 1.0, %v5393_v36 }
 0x691   :  { %v2813_v62 = vadd.f32 %v2812_v4, %v2651_v57 }
 0x693   :  { %5396 = vtanh.f32 %v2813_v62 }
 0x694   :  { %5398 = vrcp.f32 %v2809_v50 }
 0x696   :  { %v5395_v38 = vpop.eup %5394 }
 0x697   :  { %v2976_v37 = vmul.f32 %v5395_v38, %v2959_v47 }
 0x699   :  { %v2977_v63 = vadd.f32 %v2976_v37, %v5761_v1 }
 0x69b   :  { %5400 = vtanh.f32 %v2977_v63 }
 0x69c   :  { %5402 = vrcp.f32 %v2973_v34 }
 0x69d   :  { %v5397_v39 = vpop.eup %5396 }
 0x69e   :  { %v2815_v59 = vsub.f32 %v6058_v20, %v5397_v39  ;;  %v5399_v44 = vpop.eup %5398 }
 0x6a0   :  { %v2816_v3 = vmul.f32 %v5399_v44, %v2815_v59 }
 0x6a2   :  { %v6117_v43 = vadd.f32 %v5397_v39, %v2816_v3 }
 0x6a5   :  { %v5401_v19 = vpop.eup %5400 }
 0x6a6   :  { %v2979_v52 = vsub.f32 %v6061_v49, %v5401_v19  ;;  %v5403_v56 = vpop.eup %5402 }
 0x6a8   :  { %v2980_v54 = vmul.f32 %v5403_v56, %v2979_v52 }
 0x6aa   :  { %v6120_v51 = vadd.f32 %v5401_v19, %v2980_v54 }
 0x6ac   :  { %4395 = vmatmul.mubr.msk.f32.vlgmr.msra.gmra.mrb[24].mxu0 %vm460_vm3, %v6120_v51  ;;  %4756 = vmatmul.mubr.msk.f32.vlgmr.msra.gmra.mrb[42].mxu1 %vm460_vm3, %v6120_v51 }
 0x6ad   :  { %5087 = vmatpush1.bf16.msra.mxu0 %v5822_v27  ;;  %5094 = vmatpush3.bf16.msra.mxu1 %v5718_v33 }
 0x6ae   :  { %5089 = vmatprep.subr.bf16.mxu0 %v5825_v28  ;;  %5095 = vmatprep.subr.bf16.mxu1 %v5507_v25 }
 0x6af   :  { %4766 = vmatprep.mubr.msk.f32.mxu1 %vm5508_vm2, %v5506_v0  ;;  %3193 = vmatprep.mubr.f32.mxu0 %v5506_v0 }
 0x6b1   :  { %5091 = vmatpush1.bf16.msra.mxu0 %v5832_v32  ;;  %5097 = vmatpush3.bf16.msra.mxu1 %v5721_v40 }
 0x6b2   :  { %5099 = vmatprep.subr.bf16.mxu0 %v5613_v8  ;;  %5106 = vmatprep.subr.bf16.mxu1 %v5507_v25 }
 0x6b4   :  { %4767 = vmatmul.mubr.msk.f32.vlgmr.msra.gmra.mrb[44].mxu1 %vm460_vm3, %v6117_v43  ;;  %4397 = vmatmul.mubr.msk.f32.vlgmr.msra.gmra.mrb[24].mxu0 %vm460_vm3, %v6117_v43 }
 0x6b5   :  { %5101 = vmatpush1.bf16.msra.mxu0 %v5615_v9  ;;  %5108 = vmatpush3.bf16.msra.mxu1 %v5660_v21 }
 0x6b6   :  { %5103 = vmatprep.subr.bf16.mxu0 %v5629_v13  ;;  %5109 = vmatprep.subr.bf16.mxu1 %v5507_v25 }
 0x6b7   :  { %3357 = vmatprep.mubr.f32.mxu0 %v5506_v0  ;;  %4777 = vmatprep.mubr.msk.f32.mxu1 %vm5508_vm2, %v5506_v0 }
 0x6b9   :  { %5105 = vmatpush1.bf16.msra.mxu0 %v5648_v18  ;;  %5111 = vmatpush3.bf16.msra.mxu1 %v5679_v26 }
 0x6ba   :  { %5113 = vmatprep.subr.bf16.mxu0 %v5723_v41  ;;  %5120 = vmatprep.subr.bf16.mxu1 %v5507_v25 }
 0x6bc   :  { %4401 = vmatmul.mubr.msk.f32.vlgmr.msra.gmra.mrb[12].mxu0 %vm460_vm3, %v6120_v51  ;;  %4778 = vmatmul.mubr.msk.f32.vlgmr.msra.gmra.mrb[46].mxu1 %vm460_vm3, %v6120_v51 }
 0x6bd   :  { %5115 = vmatpush1.bf16.msra.mxu0 %v5725_v42  ;;  %5122 = vmatpush3.bf16.msra.mxu1 %v5802_v61 }
 0x6be   :  { %5117 = vmatprep.subr.bf16.mxu0 %v5728_v46  ;;  %5123 = vmatprep.subr.bf16.mxu1 %v5507_v25 }
 0x6bf   :  { %3521 = vmatprep.mubr.f32.mxu0 %v5506_v0  ;;  %4788 = vmatprep.mubr.msk.f32.mxu1 %vm5508_vm2, %v5506_v0 }
 0x6c1   :  { %5119 = vmatpush1.bf16.msra.mxu0 %v5732_v48  ;;  %5125 = vmatpush3.bf16.msra.mxu1 %v5811_v58 }
 0x6c2   :  { %5127 = vmatprep.subr.bf16.mxu0 %v5816_v10  ;;  %5134 = vmatprep.subr.bf16.mxu1 %v5507_v25 }
 0x77f   :  { %v3122_v1 = vpop.f32.mrb[42].mxu1 }
 0x780   :  { %v4757_v20 = vpop.f32.mrb[43].mxu1  ;;  %v3123_v52 = vadd.f32 %v3122_v1, %v5877_v6 }
 0x787   :  { %v3266_v49 = vpop.f32.mrb[44].mxu1  ;;  %v3195_v15 = vpop.f32.mrb[24].mxu0 }
 0x788   :  { %v5245_v16 = vadd.f32 %v5863_v2, %v3195_v15  ;;  %v4768_v60 = vpop.f32.mrb[45].mxu1  ;;  %v3197_v22 = vpop.f32.mrb[25].mxu0  ;;  %v3267_v19 = vadd.f32 %v3266_v49, %v5874_v5 }
 0x789   :  { %v5247_v4 = vadd.f32 %v5868_v31, %v3197_v22 }
 0x78a   :  { %v4399_v30 = vmul.f32 -1.442695, %v5245_v16 }
 0x78b   :  { %v4400_v38 = vmul.f32 -1.442695, %v5247_v4 }
 0x78c   :  { %5404 = vpow2.f32 %v4399_v30 }
 0x78f   :  { %v3359_v45 = vpop.f32.mrb[12].mxu0  ;;  %v3430_v57 = vpop.f32.mrb[46].mxu1 }
 0x790   :  { %v5215_v62 = vadd.f32 %v5782_v17, %v3359_v45  ;;  %v3361_v50 = vpop.f32.mrb[13].mxu0  ;;  %v4779_v36 = vpop.f32.mrb[47].mxu1 }
 0x791   :  { %v5217_v34 = vadd.f32 %v5795_v29, %v3361_v50  ;;  %v3431_v29 = vadd.f32 %v3430_v57, %v5799_v35 }
 0x792   :  { %v4403_v47 = vmul.f32 -1.442695, %v5215_v62 }
 0x793   :  { %v4404_v39 = vmul.f32 -1.442695, %v5217_v34 }
 0x794   :  { %5406 = vpow2.f32 %v4403_v47 }
 0x795   :  { %5408 = vpow2.f32 %v4400_v38 }
 0x796   :  { %v5405_v37 = vpop.eup %5404 }
 0x797   :  { %v3274_v63 = vadd.f32 1.0, %v5405_v37 }
 0x799   :  { %5410 = vrcp.f32 %v3274_v63 }
 0x79a   :  { %5412 = vpow2.f32 %v4404_v39 }
 0x79e   :  { %v5407_v59 = vpop.eup %5406 }
 0x79f   :  { %v3438_v44 = vadd.f32 1.0, %v5407_v59  ;;  %v5409_v3 = vpop.eup %5408 }
 0x7a0   :  { %v3281_v20 = vadd.f32 1.0, %v5409_v3 }
 0x7a1   :  { %5414 = vrcp.f32 %v3438_v44 }
 0x7a3   :  { %v5411_v17 = vpop.eup %5410 }
 0x7a4   :  { %v3284_v56 = vmul.f32 %v5411_v17, %v3267_v19  ;;  %v5413_v15 = vpop.eup %5412 }
 0x7a5   :  { %v3445_v30 = vadd.f32 1.0, %v5413_v15 }
 0x7a6   :  { %v3285_v54 = vadd.f32 %v3284_v56, %v3123_v52 }
 0x7a8   :  { %5416 = vtanh.f32 %v3285_v54 }
 0x7a9   :  { %5418 = vrcp.f32 %v3281_v20 }
 0x7ab   :  { %v5415_v16 = vpop.eup %5414 }
 0x7ac   :  { %v3448_v60 = vmul.f32 %v5415_v16, %v3431_v29 }
 0x7ae   :  { %v3449_v22 = vadd.f32 %v3448_v60, %v5772_v11  ;;  %v239_v11 = vadd.f32 %v5753_v55, %v5788_v23 }
 0x7b0   :  { %5420 = vtanh.f32 %v3449_v22 }
 0x7b1   :  { %5422 = vrcp.f32 %v3445_v30 }
 0x7b2   :  { %v5417_v45 = vpop.eup %5416 }
 0x7b3   :  { %v3287_v49 = vsub.f32 %v6117_v43, %v5417_v45  ;;  %v5419_v4 = vpop.eup %5418 }
 0x7b5   :  { %v3288_v1 = vmul.f32 %v5419_v4, %v3287_v49 }
 0x7b7   :  { %v6176_v62 = vadd.f32 %v5417_v45, %v3288_v1 }
 0x7ba   :  { %v5421_v50 = vpop.eup %5420 }
 0x7bb   :  { %v3451_v36 = vsub.f32 %v6120_v51, %v5421_v50  ;;  %v5423_v47 = vpop.eup %5422 }
 0x7bd   :  { %v3452_v38 = vmul.f32 %v5423_v47, %v3451_v36 }
 0x7bf   :  { %v6179_v57 = vadd.f32 %v5421_v50, %v3452_v38 }
 0x7c1   :  { %4405 = vmatmul.mubr.msk.f32.vlgmr.msra.gmra.mrb[26].mxu0 %vm460_vm3, %v6179_v57  ;;  %4789 = vmatmul.mubr.msk.f32.vlgmr.msra.gmra.mrb[48].mxu1 %vm460_vm3, %v6179_v57 }
 0x7c2   :  { %5129 = vmatpush1.bf16.msra.mxu0 %v5822_v27  ;;  %5136 = vmatpush3.bf16.msra.mxu1 %v5718_v33 }
 0x7c3   :  { %5131 = vmatprep.subr.bf16.mxu0 %v5825_v28  ;;  %5137 = vmatprep.subr.bf16.mxu1 %v5507_v25 }
 0x7c4   :  { %4799 = vmatprep.mubr.msk.f32.mxu1 %vm5508_vm2, %v5506_v0  ;;  %3665 = vmatprep.mubr.f32.mxu0 %v5506_v0 }
 0x7c6   :  { %5133 = vmatpush1.bf16.msra.mxu0 %v5832_v32  ;;  %5139 = vmatpush3.bf16.msra.mxu1 %v5721_v40 }
 0x7c7   :  { %5141 = vmatprep.subr.bf16.mxu0 %v5613_v8  ;;  %5148 = vmatprep.subr.bf16.mxu1 %v5507_v25 }
 0x7c9   :  { %4800 = vmatmul.mubr.msk.f32.vlgmr.msra.gmra.mrb[50].mxu1 %vm460_vm3, %v6176_v62  ;;  %4407 = vmatmul.mubr.msk.f32.vlgmr.msra.gmra.mrb[26].mxu0 %vm460_vm3, %v6176_v62 }
 0x7ca   :  { %5143 = vmatpush1.bf16.msra.mxu0 %v5615_v9  ;;  %5150 = vmatpush3.bf16.msra.mxu1 %v5660_v21 }
 0x7cb   :  { %5145 = vmatprep.subr.bf16.mxu0 %v5629_v13  ;;  %5151 = vmatprep.subr.bf16.mxu1 %v5507_v25 }
 0x7cc   :  { %3829 = vmatprep.mubr.f32.mxu0 %v5506_v0  ;;  %4810 = vmatprep.mubr.msk.f32.mxu1 %vm5508_vm2, %v5506_v0 }
 0x7ce   :  { %5147 = vmatpush1.bf16.msra.mxu0 %v5648_v18  ;;  %5153 = vmatpush3.bf16.msra.mxu1 %v5679_v26 }
 0x7cf   :  { %5162 = vmatprep.subr.bf16.mxu1 %v5507_v25  ;;  %5155 = vmatprep.subr.bf16.mxu0 %v5723_v41 }
 0x7d1   :  { %4411 = vmatmul.mubr.msk.f32.vlgmr.msra.gmra.mrb[28].mxu0 %vm460_vm3, %v6179_v57  ;;  %4811 = vmatmul.mubr.msk.f32.vlgmr.msra.gmra.mrb[52].mxu1 %vm460_vm3, %v6179_v57 }
 0x7d2   :  { %5164 = vmatpush3.bf16.msra.mxu1 %v5802_v61  ;;  %5157 = vmatpush1.bf16.msra.mxu0 %v5725_v42  ;;  %v237_v42 = vadd.f32 %v5750_v53, %v5775_v12 }
 0x7d3   :  { %5165 = vmatprep.subr.bf16.mxu1 %v5507_v25  ;;  %5159 = vmatprep.subr.bf16.mxu0 %v5728_v46 }
 0x7d4   :  { %3993 = vmatprep.mubr.f32.mxu0 %v5506_v0  ;;  %4821 = vmatprep.mubr.msk.f32.mxu1 %vm5508_vm2, %v5506_v0 }
 0x7d6   :  { %5167 = vmatpush3.bf16.msra.mxu1 %v5811_v58  ;;  %5161 = vmatpush1.bf16.msra.mxu0 %v5732_v48  ;;  %v5219_v48 = vadd.f32 %v5778_v14, %v237_v42 }
 0x7d7   :  { %5176 = vmatprep.subr.bf16.mxu1 %v5507_v25  ;;  %5169 = vmatprep.subr.bf16.mxu0 %v5816_v10  ;;  %v5222_v10 = vadd.f32 %v5791_v24, %v239_v11 }
 0x894   :  { %v3594_v8 = vpop.f32.mrb[48].mxu1 }
 0x895   :  { %v4790_v9 = vpop.f32.mrb[49].mxu1  ;;  %v3595_v19 = vadd.f32 %v3594_v8, %v5877_v6 }
 0x89c   :  { %v3738_v13 = vpop.f32.mrb[50].mxu1  ;;  %v3667_v18 = vpop.f32.mrb[26].mxu0 }
 0x89d   :  { %v5249_v21 = vadd.f32 %v5863_v2, %v3667_v18  ;;  %v4801_v26 = vpop.f32.mrb[51].mxu1  ;;  %v3669_v41 = vpop.f32.mrb[27].mxu0  ;;  %v3739_v24 = vadd.f32 %v3738_v13, %v5874_v5 }
 0x89e   :  { %v5251_v43 = vadd.f32 %v5868_v31, %v3669_v41 }
 0x89f   :  { %v4409_v46 = vmul.f32 -1.442695, %v5249_v21 }
 0x8a0   :  { %v4410_v59 = vmul.f32 -1.442695, %v5251_v43 }
 0x8a1   :  { %5424 = vpow2.f32 %v4409_v46 }
 0x8a4   :  { %v3831_v61 = vpop.f32.mrb[28].mxu0  ;;  %v3902_v58 = vpop.f32.mrb[52].mxu1 }
 0x8a5   :  { %v5220_v51 = vadd.f32 %v5219_v48, %v3831_v61  ;;  %v3833_v37 = vpop.f32.mrb[29].mxu0  ;;  %v4812_v63 = vpop.f32.mrb[53].mxu1  ;;  %v3903_v20 = vadd.f32 %v3902_v58, %v5799_v35 }
 0x8a6   :  { %v5223_v34 = vadd.f32 %v5222_v10, %v3833_v37  ;;  %v4421_v63 = vld [vmem:[%s6290_s10] ss:$0 sm:$0xff] }
 0x8a7   :  { %v4413_v39 = vmul.f32 -1.442695, %v5220_v51 }
 0x8a8   :  { %v4414_v55 = vmul.f32 -1.442695, %v5223_v34 }
 0x8a9   :  { %5426 = vpow2.f32 %v4413_v39 }
 0x8aa   :  { %5428 = vpow2.f32 %v4410_v59 }
 0x8ab   :  { %v5425_v53 = vpop.eup %5424 }
 0x8ac   :  { %v3746_v12 = vadd.f32 1.0, %v5425_v53 }
 0x8ae   :  { %5430 = vrcp.f32 %v3746_v12 }
 0x8af   :  { %5432 = vpow2.f32 %v4414_v55 }
 0x8b3   :  { %v5427_v23 = vpop.eup %5426 }
 0x8b4   :  { %v3910_v14 = vadd.f32 1.0, %v5427_v23  ;;  %v5429_v44 = vpop.eup %5428 }
 0x8b5   :  { %v3753_v56 = vadd.f32 1.0, %v5429_v44 }
 0x8b6   :  { %5434 = vrcp.f32 %v3910_v14 }
 0x8b8   :  { %v5431_v3 = vpop.eup %5430 }
 0x8b9   :  { %v3756_v17 = vmul.f32 %v5431_v3, %v3739_v24  ;;  %v5433_v54 = vpop.eup %5432 }
 0x8ba   :  { %v3917_v60 = vadd.f32 1.0, %v5433_v54 }
 0x8bb   :  { %v3757_v52 = vadd.f32 %v3756_v17, %v3595_v19 }
 0x8bd   :  { %5436 = vtanh.f32 %v3757_v52 }
 0x8be   :  { %5438 = vrcp.f32 %v3753_v56 }
 0x8c0   :  { %v5435_v15 = vpop.eup %5434 }
 0x8c1   :  { %v3920_v29 = vmul.f32 %v5435_v15, %v3903_v20 }
 0x8c3   :  { %v3921_v16 = vadd.f32 %v3920_v29, %v5770_v7  ;;  %v4235_v7 = vld [vmem:[%s6289_s9 + $0x8] sm:$0xff] }
 0x8c5   :  { %5440 = vtanh.f32 %v3921_v16 }
 0x8c6   :  { %5442 = vrcp.f32 %v3917_v60 }
 0x8c7   :  { %v5437_v22 = vpop.eup %5436 }
 0x8c8   :  { %v3759_v30 = vsub.f32 %v6176_v62, %v5437_v22  ;;  %v5439_v45 = vpop.eup %5438 }
 0x8ca   :  { %v3760_v49 = vmul.f32 %v5439_v45, %v3759_v30 }
 0x8cc   :  { %v3761_v4 = vadd.f32 %v5437_v22, %v3760_v49 }
 0x8cf   :  { %v5441_v1 = vpop.eup %5440 }
 0x8d0   :  { %v3923_v50 = vsub.f32 %v6179_v57, %v5441_v1  ;;  %v5443_v36 = vpop.eup %5442 }
 0x8d2   :  { %v3924_v47 = vmul.f32 %v5443_v36, %v3923_v50 }
 0x8d4   :  { %v3925_v38 = vadd.f32 %v5441_v1, %v3924_v47 }
 0x8d6   :  { %4415 = vmatmul.mubr.msk.f32.vlgmr.msra.gmra.mrb[30].mxu0 %vm460_vm3, %v3925_v38  ;;  %4822 = vmatmul.mubr.msk.f32.vlgmr.msra.gmra.mrb[54].mxu1 %vm460_vm3, %v3925_v38 }
 0x8d7   :  { %5178 = vmatpush3.bf16.msra.mxu1 %v5718_v33  ;;  %5171 = vmatpush1.bf16.msra.mxu0 %v5822_v27  ;;  %v4234_v33 = vld [vmem:[%s6289_s9] sm:$0xff]  ;;  %v4237_v27 = vld [vmem:[%s6289_s9 + $0x18] sm:$0xff] }
 0x8d8   :  { %5179 = vmatprep.subr.bf16.mxu1 %v5507_v25  ;;  %5173 = vmatprep.subr.bf16.mxu0 %v5825_v28  ;;  %v5183_v35 = vpack.c.bf16 %v4235_v7, %v4234_v33 }
 0x8d9   :  { %4832 = vmatprep.mubr.msk.f32.mxu1 %vm5508_vm2, %v5506_v0  ;;  %4137 = vmatprep.mubr.f32.mxu0 %v5506_v0 }
 0x8db   :  { %5181 = vmatpush3.bf16.msra.mxu1 %v5721_v40  ;;  %5175 = vmatpush1.bf16.msra.mxu0 %v5832_v32  ;;  %v4236_v40 = vld [vmem:[%s6289_s9 + $0x10] sm:$0xff] }
 0x8dc   :  { %5182 = vmatprep.subr.bf16.mxu0 %v5507_v25  ;;  %v5186_v28 = vpack.c.bf16 %v4237_v27, %v4236_v40 }
 0x8de   :  { %4833 = vmatmul.mubr.msk.f32.vlgmr.msra.gmra.mrb[56].mxu1 %vm460_vm3, %v3761_v4  ;;  %4417 = vmatmul.mubr.msk.f32.vlgmr.msra.gmra.mrb[30].mxu0 %vm460_vm3, %v3761_v4 }
 0x8df   :  { %4843 = vmatprep.mubr.msk.f32.mxu0 %vm5508_vm2, %v5506_v0  ;;  %5184 = vmatpush3.bf16.msra.mxu0 %v5183_v35 }
 0x8e0   :  { %5185 = vmatprep.subr.bf16.mxu0 %v5507_v25 }
 0x8e3   :  { %5187 = vmatpush3.bf16.msra.mxu0 %v5186_v28 }
 0x9a9   :  { %v4066_v0 = vpop.f32.mrb[54].mxu1 }
 0x9aa   :  { %v4823_v32 = vpop.f32.mrb[55].mxu1  ;;  %v4067_v48 = vadd.f32 %v4066_v0, %v5877_v6 }
 0x9b1   :  { %v4210_v62 = vpop.f32.mrb[56].mxu1  ;;  %v4139_v57 = vpop.f32.mrb[30].mxu0 }
 0x9b2   :  { %v5253_v8 = vadd.f32 %v5863_v2, %v4139_v57  ;;  %v4834_v9 = vpop.f32.mrb[57].mxu1  ;;  %v4141_v13 = vpop.f32.mrb[31].mxu0  ;;  %v4211_v25 = vadd.f32 %v4210_v62, %v5874_v5 }
 0x9b3   :  { %v5255_v21 = vadd.f32 %v5868_v31, %v4141_v13 }
 0x9b4   :  { %v4419_v18 = vmul.f32 -1.442695, %v5253_v8 }
 0x9b5   :  { %v4420_v26 = vmul.f32 -1.442695, %v5255_v21 }
 0x9b6   :  { %5444 = vpow2.f32 %v4419_v18 }
 0x9b7   :  { %5446 = vpow2.f32 %v4420_v26 }
 0x9c0   :  { %v5445_v41 = vpop.eup %5444 }
 0x9c1   :  { %v4218_v42 = vadd.f32 1.0, %v5445_v41  ;;  %v5447_v46 = vpop.eup %5446 }
 0x9c2   :  { %v4225_v2 = vadd.f32 1.0, %v5447_v46 }
 0x9c3   :  { %5448 = vrcp.f32 %v4218_v42 }
 0x9cd   :  { %v5449_v11 = vpop.eup %5448 }
 0x9ce   :  { %v4228_v61 = vmul.f32 %v5449_v11, %v4211_v25 }
 0x9d0   :  { %v4229_v58 = vadd.f32 %v4228_v61, %v4067_v48 }
 0x9d2   :  { %5450 = vtanh.f32 %v4229_v58 }
 0x9d3   :  { %5452 = vrcp.f32 %v4225_v2 }
 0x9dc   :  { %v5451_v10 = vpop.eup %5450 }
 0x9dd   :  { %v4231_v43 = vsub.f32 %v3761_v4, %v5451_v10  ;;  %v5453_v51 = vpop.eup %5452 }
 0x9df   :  { %v4232_v31 = vmul.f32 %v5453_v51, %v4231_v43 }
 0x9e1   :  { %v4233_v37 = vadd.f32 %v5451_v10, %v4232_v31 }
 0x9e3   :  { %4844 = vmatmul.mubr.msk.f32.vlgmr.msra.gmra.mrb[32].mxu0 %vm460_vm3, %v4233_v37 }
 0xab6   :  { %v4314_v5 = vpop.f32.mrb[32].mxu0 }
 0xab7   :  { %v4315_v34 = vadd.f32 %v4421_v63, %v4314_v5  ;;  %v4845_v6 = vpop.f32.mrb[33].mxu0 }
 0xab9   :  { %4319 = vst.msk [vmem:[%s6291_s11] sm:$0xff] %vm4318_vm4, %v4315_v34 }
 0xaba   :  { %4324 = vsyncpa [#allocation4], 1 }
 0xabb   :  { %4325 = vsyncpa [#allocation6], 1 }

</bundles_post_ra>
